<compile_context>
chip_gen: v7x
topology: tpu7x:2x2x1
jax: 0.10.0
libtpu: 0.0.40
codegen_flags: <defaults>
</compile_context>

<pallas_src>
import functools

import jax
import jax.numpy as jnp
from jax.experimental import pallas as pl
from jax.experimental.pallas import tpu as pltpu


def _nbeats_kernel(x_ref, w_ref, b_ref, back_ref, fore_ref, *,
                   num_blocks, input_size, horizon, hidden):
    """x_ref: (input_size, bt) transposed batch tile.
    w_ref: (num_blocks*rows_per_block, wcols) packed (out, in) weights.
    b_ref: (num_blocks*rows_per_block, 1) packed column biases.
    back_ref: (input_size, bt), fore_ref: (horizon, bt)."""
    rows_per_block = 3 * hidden + input_size + horizon
    bt = x_ref.shape[1]

    back = x_ref[...]                                   # (in, bt)
    fore = jnp.zeros((horizon, bt), jnp.float32)        # (h,  bt)

    for blk in range(num_blocks):                       # static unroll (6 blocks)
        r = blk * rows_per_block
        w1 = w_ref[r:r + hidden, :input_size]           # (hid, in)
        w2 = w_ref[r + hidden:r + 2 * hidden, :hidden]  # (hid, hid)
        w3 = w_ref[r + 2 * hidden:r + 3 * hidden, :hidden]
        wc = w_ref[r + 3 * hidden:r + rows_per_block, :hidden]   # (in+h, hid)
        b1 = b_ref[r:r + hidden, :]                      # (hid, 1) lane-broadcast
        b2 = b_ref[r + hidden:r + 2 * hidden, :]
        b3 = b_ref[r + 2 * hidden:r + 3 * hidden, :]
        bc = b_ref[r + 3 * hidden:r + rows_per_block, :]

        h = jnp.maximum(
            jnp.dot(w1, back, preferred_element_type=jnp.float32) + b1, 0.0)
        h = jnp.maximum(
            jnp.dot(w2, h, preferred_element_type=jnp.float32) + b2, 0.0)
        h = jnp.maximum(
            jnp.dot(w3, h, preferred_element_type=jnp.float32) + b3, 0.0)
        # Fused theta projection: one dot yields both deltas; the backcast rows
        # were pre-negated in the wrapper so both updates are plain adds.
        d = jnp.dot(wc, h, preferred_element_type=jnp.float32) + bc   # (in+h, bt)
        back = back + d[:input_size, :]
        fore = fore + d[input_size:, :]

    back_ref[...] = back
    fore_ref[...] = fore


def _round_up(a, m):
    return ((a + m - 1) // m) * m


def _pack_params(params):
    """Fuse the theta projection and pack everything into two slabs:
       wpack: (num_blocks*rows_per_block, wcols) with rows per block
              [W1^T | W2^T | W3^T | Wcomb^T]   (padded to a common width)
       bpack: (num_blocks*rows_per_block, 1)   matching column biases."""
    hp = jax.lax.Precision.HIGHEST
    f32 = jnp.float32
    nb, input_size, hidden = params["w1"].shape
    horizon = params["wf"].shape[2]
    wcols = max(hidden, input_size)

    # Fused theta projection (backcast half pre-negated).
    wbf = jnp.concatenate([-params["wb"], params["wf"]], axis=-1)        # (nb,hid,in+h)
    bbf = jnp.concatenate([-params["bb"], params["bf"]], axis=-1)        # (nb,1, in+h)
    wcomb = jnp.einsum("nij,njk->nik", params["w4"], wbf, precision=hp)  # (nb,hid,in+h)
    bcomb = jnp.einsum("nij,njk->nik", params["b4"], wbf, precision=hp) + bbf

    def t(a):                     # (nb, in, out) -> (nb, out, in)
        return jnp.transpose(a, (0, 2, 1)).astype(f32)

    def padw(a):                  # pad last dim to the common slab width
        return jnp.pad(a, ((0, 0), (0, 0), (0, wcols - a.shape[2])))

    rows_per_block = 3 * hidden + input_size + horizon
    wpack = jnp.concatenate(
        [padw(t(params["w1"])), padw(t(params["w2"])),
         padw(t(params["w3"])), padw(t(wcomb))], axis=1)
    wpack = wpack.reshape(nb * rows_per_block, wcols)

    bpack = jnp.concatenate(
        [t(params["b1"]), t(params["b2"]), t(params["b3"]), t(bcomb)],
        axis=1).reshape(nb * rows_per_block, 1)
    return wpack, bpack, rows_per_block, wcols


def nbeats_forward(x, params, *, batch_tile=512):
    """x: (B, input_size) float32.  Returns (backcast, forecast) exactly like
    PyTorch NBeatsModel.forward: (B, input_size), (B, forecast_horizon)."""
    f32 = jnp.float32
    B, input_size = x.shape
    nb, _, hidden = params["w1"].shape
    horizon = params["wf"].shape[2]

    wpack, bpack, rows_per_block, wcols = _pack_params(params)
    wrows = nb * rows_per_block

    # --- batch tiling policy ------------------------------------------------
    # Lane-dense tiles (multiples of 128).  Cap the tile at ceil(B/2) so any
    # reasonably large batch produces >=2 grid steps (both TensorCores on v7x);
    # ragged batches are zero-padded and sliced back afterwards.
    LANE = 128
    bt = max(LANE, min(_round_up(batch_tile, LANE),
                       _round_up(pl.cdiv(B, 2), LANE)))
    Bp = _round_up(B, bt)
    grid = (Bp // bt,)

    # Transposed, batch-padded input: (input_size, Bp), batch on the lane axis.
    xT = jnp.transpose(x.astype(f32))
    if Bp != B:
        xT = jnp.pad(xT, ((0, 0), (0, Bp - B)))

    kernel = functools.partial(_nbeats_kernel, num_blocks=nb,
                               input_size=input_size, horizon=horizon,
                               hidden=hidden)

    fn = pl.pallas_call(
        kernel,
        grid=grid,
        in_specs=[
            pl.BlockSpec((input_size, bt), lambda i: (0, i)),   # x tile
            pl.BlockSpec((wrows, wcols), lambda i: (0, 0)),     # weights (resident)
            pl.BlockSpec((wrows, 1), lambda i: (0, 0)),         # biases  (resident)
        ],
        out_specs=[
            pl.BlockSpec((input_size, bt), lambda i: (0, i)),   # backcast^T
            pl.BlockSpec((horizon, bt), lambda i: (0, i)),      # forecast^T
        ],
        out_shape=[
            jax.ShapeDtypeStruct((input_size, Bp), f32),
            jax.ShapeDtypeStruct((horizon, Bp), f32),
        ],
        compiler_params=pltpu.CompilerParams(
            dimension_semantics=("parallel",)),
    )
    backT, foreT = fn(xT, wpack, bpack)
    return jnp.transpose(backT[:, :B]), jnp.transpose(foreT[:, :B])


def init_params(key, input_size, forecast_horizon, hidden, num_blocks):
    """Deterministic synthetic params mirroring the PyTorch parameterization.
    Weights stored as (in, out); biases as (num_blocks, 1, out)."""
    def mk(k, shape, scale):
        return scale * jax.random.normal(k, shape, dtype=jnp.float32)

    keys = jax.random.split(key, 12)
    nb = num_blocks
    return {
        "w1": mk(keys[0], (nb, input_size, hidden), 1.0 / jnp.sqrt(input_size)),
        "b1": mk(keys[1], (nb, 1, hidden), 0.01),
        "w2": mk(keys[2], (nb, hidden, hidden), 1.0 / jnp.sqrt(hidden)),
        "b2": mk(keys[3], (nb, 1, hidden), 0.01),
        "w3": mk(keys[4], (nb, hidden, hidden), 1.0 / jnp.sqrt(hidden)),
        "b3": mk(keys[5], (nb, 1, hidden), 0.01),
        "w4": mk(keys[6], (nb, hidden, hidden), 1.0 / jnp.sqrt(hidden)),
        "b4": mk(keys[7], (nb, 1, hidden), 0.01),
        "wb": mk(keys[8], (nb, hidden, input_size), 1.0 / jnp.sqrt(hidden)),
        "bb": mk(keys[9], (nb, 1, input_size), 0.01),
        "wf": mk(keys[10], (nb, hidden, forecast_horizon), 1.0 / jnp.sqrt(hidden)),
        "bf": mk(keys[11], (nb, 1, forecast_horizon), 0.01),
    }


def nbeats_forward_ref(x, params):
    """Pure-JAX reference mirroring the PyTorch forward (unfused), f32 HIGHEST."""
    hp = jax.lax.Precision.HIGHEST
    B = x.shape[0]
    num_blocks = params["w1"].shape[0]
    forecast = jnp.zeros((B, params["wf"].shape[2]), jnp.float32)
    backcast = x
    for i in range(num_blocks):
        h = jnp.maximum(jnp.dot(backcast, params["w1"][i], precision=hp)
                        + params["b1"][i][0], 0.0)
        h = jnp.maximum(jnp.dot(h, params["w2"][i], precision=hp)
                        + params["b2"][i][0], 0.0)
        h = jnp.maximum(jnp.dot(h, params["w3"][i], precision=hp)
                        + params["b3"][i][0], 0.0)
        theta = jnp.dot(h, params["w4"][i], precision=hp) + params["b4"][i][0]
        backcast = backcast - (jnp.dot(theta, params["wb"][i], precision=hp)
                               + params["bb"][i][0])
        forecast = forecast + (jnp.dot(theta, params["wf"][i], precision=hp)
                               + params["bf"][i][0])
    return backcast, forecast


if __name__ == "__main__":
    # Small shapes consistent with the module: window 16, horizon 8, hidden 32,
    # 2 stacks * 3 blocks = 6 blocks.
    batch = 4
    input_size = 16
    forecast_horizon = 8
    hidden = 32
    stacks, blocks_per_stack = 2, 3
    num_blocks = stacks * blocks_per_stack

    key = jax.random.PRNGKey(0)
    kx, kp, kx2 = jax.random.split(key, 3)
    x = jax.random.normal(kx, (batch, input_size), dtype=jnp.float32)
    params = init_params(kp, input_size, forecast_horizon, hidden, num_blocks)

    fwd = jax.jit(nbeats_forward, static_argnames=("batch_tile",))

    # Small batch: single lane-dense 128-column tile, everything VMEM-resident.
    backcast, forecast = fwd(x, params)
    backcast = jax.block_until_ready(backcast)
    forecast = jax.block_until_ready(forecast)

    ref_back, ref_fore = nbeats_forward_ref(x, params)
    err_b = float(jnp.max(jnp.abs(backcast - ref_back)))
    err_f = float(jnp.max(jnp.abs(forecast - ref_fore)))
    assert err_b < 1e-3, f"backcast mismatch: {err_b}"
    assert err_f < 1e-3, f"forecast mismatch: {err_f}"

    # Larger batch: exercises the >=2-step "parallel" grid (both TCs on v7x).
    x2 = jax.random.normal(kx2, (256, input_size), dtype=jnp.float32)
    b2, f2 = fwd(x2, params)
    b2 = jax.block_until_ready(b2)
    f2 = jax.block_until_ready(f2)
    rb2, rf2 = nbeats_forward_ref(x2, params)
    assert float(jnp.max(jnp.abs(b2 - rb2))) < 1e-3
    assert float(jnp.max(jnp.abs(f2 - rf2))) < 1e-3

    print("KERNEL_OK")
</pallas_src>

<mosaic_0001>
module attributes {stable_mosaic.version = 11 : i64} {
  func.func @_nbeats_kernel(%arg0: i32, %arg1: memref<16x128xf32, #tpu.memory_space<vmem>>, %arg2: memref<720x32xf32, #tpu.memory_space<vmem>>, %arg3: memref<720x1xf32, #tpu.memory_space<vmem>>, %arg4: memref<16x128xf32, #tpu.memory_space<vmem>>, %arg5: memref<8x128xf32, #tpu.memory_space<vmem>>) attributes {dimension_semantics = [#tpu.dimension_semantics<parallel>], iteration_bounds = array<i64: 1>, scalar_prefetch = 0 : i64, scratch_operands = 0 : i64, tpu.core_type = #tpu.core_type<tc>, window_params = [{transform_indices = @transform_0, window_bounds = array<i64: 16, 128>}, {pipeline_mode = #tpu.pipeline_mode<synchronous>, transform_indices = @transform_1, window_bounds = array<i64: 720, 32>}, {pipeline_mode = #tpu.pipeline_mode<synchronous>, transform_indices = @transform_2, window_bounds = array<i64: 720, 1>}, {transform_indices = @transform_3, window_bounds = array<i64: 16, 128>}, {transform_indices = @transform_4, window_bounds = array<i64: 8, 128>}]} {
    %c0 = arith.constant 0 : index
    %c0_0 = arith.constant 0 : index
    %0 = vector.load %arg1[%c0, %c0_0] : memref<16x128xf32, #tpu.memory_space<vmem>>, vector<16x128xf32>
    %cst = arith.constant 0.000000e+00 : f32
    %1 = vector.broadcast %cst : f32 to vector<8x128xf32>
    %c0_1 = arith.constant 0 : index
    %c0_2 = arith.constant 0 : index
    %2 = vector.load %arg2[%c0_1, %c0_2] : memref<720x32xf32, #tpu.memory_space<vmem>>, vector<32x16xf32>
    %c32 = arith.constant 32 : index
    %c0_3 = arith.constant 0 : index
    %3 = vector.load %arg2[%c32, %c0_3] : memref<720x32xf32, #tpu.memory_space<vmem>>, vector<32x32xf32>
    %c64 = arith.constant 64 : index
    %c0_4 = arith.constant 0 : index
    %4 = vector.load %arg2[%c64, %c0_4] : memref<720x32xf32, #tpu.memory_space<vmem>>, vector<32x32xf32>
    %c96 = arith.constant 96 : index
    %c0_5 = arith.constant 0 : index
    %5 = vector.load %arg2[%c96, %c0_5] : memref<720x32xf32, #tpu.memory_space<vmem>>, vector<24x32xf32>
    %c0_6 = arith.constant 0 : index
    %c0_7 = arith.constant 0 : index
    %6 = vector.load %arg3[%c0_6, %c0_7] : memref<720x1xf32, #tpu.memory_space<vmem>>, vector<32x1xf32>
    %c32_8 = arith.constant 32 : index
    %c0_9 = arith.constant 0 : index
    %7 = vector.load %arg3[%c32_8, %c0_9] : memref<720x1xf32, #tpu.memory_space<vmem>>, vector<32x1xf32>
    %c64_10 = arith.constant 64 : index
    %c0_11 = arith.constant 0 : index
    %8 = vector.load %arg3[%c64_10, %c0_11] : memref<720x1xf32, #tpu.memory_space<vmem>>, vector<32x1xf32>
    %c96_12 = arith.constant 96 : index
    %c0_13 = arith.constant 0 : index
    %9 = vector.load %arg3[%c96_12, %c0_13] : memref<720x1xf32, #tpu.memory_space<vmem>>, vector<24x1xf32>
    %cst_14 = arith.constant dense<0.000000e+00> : vector<32x128xf32>
    %10 = tpu.matmul %2, %0, %cst_14 {dimension_numbers = #tpu.dot_dimension_numbers<[1], [0], [0], [1], [0, 0, 1, 1], [], []>} : vector<32x16xf32>, vector<16x128xf32>, vector<32x128xf32> -> vector<32x128xf32>
    %11 = vector.broadcast %6 : vector<32x1xf32> to vector<32x128xf32>
    %12 = arith.addf %10, %11 : vector<32x128xf32>
    %cst_15 = arith.constant 0.000000e+00 : f32
    %13 = vector.broadcast %cst_15 : f32 to vector<32x128xf32>
    %14 = arith.maximumf %12, %13 : vector<32x128xf32>
    %cst_16 = arith.constant dense<0.000000e+00> : vector<32x128xf32>
    %15 = tpu.matmul %3, %14, %cst_16 {dimension_numbers = #tpu.dot_dimension_numbers<[1], [0], [0], [1], [0, 0, 1, 1], [], []>} : vector<32x32xf32>, vector<32x128xf32>, vector<32x128xf32> -> vector<32x128xf32>
    %16 = vector.broadcast %7 : vector<32x1xf32> to vector<32x128xf32>
    %17 = arith.addf %15, %16 : vector<32x128xf32>
    %cst_17 = arith.constant 0.000000e+00 : f32
    %18 = vector.broadcast %cst_17 : f32 to vector<32x128xf32>
    %19 = arith.maximumf %17, %18 : vector<32x128xf32>
    %cst_18 = arith.constant dense<0.000000e+00> : vector<32x128xf32>
    %20 = tpu.matmul %4, %19, %cst_18 {dimension_numbers = #tpu.dot_dimension_numbers<[1], [0], [0], [1], [0, 0, 1, 1], [], []>} : vector<32x32xf32>, vector<32x128xf32>, vector<32x128xf32> -> vector<32x128xf32>
    %21 = vector.broadcast %8 : vector<32x1xf32> to vector<32x128xf32>
    %22 = arith.addf %20, %21 : vector<32x128xf32>
    %cst_19 = arith.constant 0.000000e+00 : f32
    %23 = vector.broadcast %cst_19 : f32 to vector<32x128xf32>
    %24 = arith.maximumf %22, %23 : vector<32x128xf32>
    %cst_20 = arith.constant dense<0.000000e+00> : vector<24x128xf32>
    %25 = tpu.matmul %5, %24, %cst_20 {dimension_numbers = #tpu.dot_dimension_numbers<[1], [0], [0], [1], [0, 0, 1, 1], [], []>} : vector<24x32xf32>, vector<32x128xf32>, vector<24x128xf32> -> vector<24x128xf32>
    %26 = vector.broadcast %9 : vector<24x1xf32> to vector<24x128xf32>
    %27 = arith.addf %25, %26 : vector<24x128xf32>
    %28 = vector.extract_strided_slice %27 {offsets = [0, 0], sizes = [16, 128], strides = [1, 1]} : vector<24x128xf32> to vector<16x128xf32>
    %29 = arith.addf %0, %28 : vector<16x128xf32>
    %30 = vector.extract_strided_slice %27 {offsets = [16, 0], sizes = [8, 128], strides = [1, 1]} : vector<24x128xf32> to vector<8x128xf32>
    %31 = arith.addf %1, %30 : vector<8x128xf32>
    %c120 = arith.constant 120 : index
    %c0_21 = arith.constant 0 : index
    %32 = vector.load %arg2[%c120, %c0_21] : memref<720x32xf32, #tpu.memory_space<vmem>>, vector<32x16xf32>
    %c152 = arith.constant 152 : index
    %c0_22 = arith.constant 0 : index
    %33 = vector.load %arg2[%c152, %c0_22] : memref<720x32xf32, #tpu.memory_space<vmem>>, vector<32x32xf32>
    %c184 = arith.constant 184 : index
    %c0_23 = arith.constant 0 : index
    %34 = vector.load %arg2[%c184, %c0_23] : memref<720x32xf32, #tpu.memory_space<vmem>>, vector<32x32xf32>
    %c216 = arith.constant 216 : index
    %c0_24 = arith.constant 0 : index
    %35 = vector.load %arg2[%c216, %c0_24] : memref<720x32xf32, #tpu.memory_space<vmem>>, vector<24x32xf32>
    %c120_25 = arith.constant 120 : index
    %c0_26 = arith.constant 0 : index
    %36 = vector.load %arg3[%c120_25, %c0_26] : memref<720x1xf32, #tpu.memory_space<vmem>>, vector<32x1xf32>
    %c152_27 = arith.constant 152 : index
    %c0_28 = arith.constant 0 : index
    %37 = vector.load %arg3[%c152_27, %c0_28] : memref<720x1xf32, #tpu.memory_space<vmem>>, vector<32x1xf32>
    %c184_29 = arith.constant 184 : index
    %c0_30 = arith.constant 0 : index
    %38 = vector.load %arg3[%c184_29, %c0_30] : memref<720x1xf32, #tpu.memory_space<vmem>>, vector<32x1xf32>
    %c216_31 = arith.constant 216 : index
    %c0_32 = arith.constant 0 : index
    %39 = vector.load %arg3[%c216_31, %c0_32] : memref<720x1xf32, #tpu.memory_space<vmem>>, vector<24x1xf32>
    %cst_33 = arith.constant dense<0.000000e+00> : vector<32x128xf32>
    %40 = tpu.matmul %32, %29, %cst_33 {dimension_numbers = #tpu.dot_dimension_numbers<[1], [0], [0], [1], [0, 0, 1, 1], [], []>} : vector<32x16xf32>, vector<16x128xf32>, vector<32x128xf32> -> vector<32x128xf32>
    %41 = vector.broadcast %36 : vector<32x1xf32> to vector<32x128xf32>
    %42 = arith.addf %40, %41 : vector<32x128xf32>
    %cst_34 = arith.constant 0.000000e+00 : f32
    %43 = vector.broadcast %cst_34 : f32 to vector<32x128xf32>
    %44 = arith.maximumf %42, %43 : vector<32x128xf32>
    %cst_35 = arith.constant dense<0.000000e+00> : vector<32x128xf32>
    %45 = tpu.matmul %33, %44, %cst_35 {dimension_numbers = #tpu.dot_dimension_numbers<[1], [0], [0], [1], [0, 0, 1, 1], [], []>} : vector<32x32xf32>, vector<32x128xf32>, vector<32x128xf32> -> vector<32x128xf32>
    %46 = vector.broadcast %37 : vector<32x1xf32> to vector<32x128xf32>
    %47 = arith.addf %45, %46 : vector<32x128xf32>
    %cst_36 = arith.constant 0.000000e+00 : f32
    %48 = vector.broadcast %cst_36 : f32 to vector<32x128xf32>
    %49 = arith.maximumf %47, %48 : vector<32x128xf32>
    %cst_37 = arith.constant dense<0.000000e+00> : vector<32x128xf32>
    %50 = tpu.matmul %34, %49, %cst_37 {dimension_numbers = #tpu.dot_dimension_numbers<[1], [0], [0], [1], [0, 0, 1, 1], [], []>} : vector<32x32xf32>, vector<32x128xf32>, vector<32x128xf32> -> vector<32x128xf32>
    %51 = vector.broadcast %38 : vector<32x1xf32> to vector<32x128xf32>
    %52 = arith.addf %50, %51 : vector<32x128xf32>
    %cst_38 = arith.constant 0.000000e+00 : f32
    %53 = vector.broadcast %cst_38 : f32 to vector<32x128xf32>
    %54 = arith.maximumf %52, %53 : vector<32x128xf32>
    %cst_39 = arith.constant dense<0.000000e+00> : vector<24x128xf32>
    %55 = tpu.matmul %35, %54, %cst_39 {dimension_numbers = #tpu.dot_dimension_numbers<[1], [0], [0], [1], [0, 0, 1, 1], [], []>} : vector<24x32xf32>, vector<32x128xf32>, vector<24x128xf32> -> vector<24x128xf32>
    %56 = vector.broadcast %39 : vector<24x1xf32> to vector<24x128xf32>
    %57 = arith.addf %55, %56 : vector<24x128xf32>
    %58 = vector.extract_strided_slice %57 {offsets = [0, 0], sizes = [16, 128], strides = [1, 1]} : vector<24x128xf32> to vector<16x128xf32>
    %59 = arith.addf %29, %58 : vector<16x128xf32>
    %60 = vector.extract_strided_slice %57 {offsets = [16, 0], sizes = [8, 128], strides = [1, 1]} : vector<24x128xf32> to vector<8x128xf32>
    %61 = arith.addf %31, %60 : vector<8x128xf32>
    %c240 = arith.constant 240 : index
    %c0_40 = arith.constant 0 : index
    %62 = vector.load %arg2[%c240, %c0_40] : memref<720x32xf32, #tpu.memory_space<vmem>>, vector<32x16xf32>
    %c272 = arith.constant 272 : index
    %c0_41 = arith.constant 0 : index
    %63 = vector.load %arg2[%c272, %c0_41] : memref<720x32xf32, #tpu.memory_space<vmem>>, vector<32x32xf32>
    %c304 = arith.constant 304 : index
    %c0_42 = arith.constant 0 : index
    %64 = vector.load %arg2[%c304, %c0_42] : memref<720x32xf32, #tpu.memory_space<vmem>>, vector<32x32xf32>
    %c336 = arith.constant 336 : index
    %c0_43 = arith.constant 0 : index
    %65 = vector.load %arg2[%c336, %c0_43] : memref<720x32xf32, #tpu.memory_space<vmem>>, vector<24x32xf32>
    %c240_44 = arith.constant 240 : index
    %c0_45 = arith.constant 0 : index
    %66 = vector.load %arg3[%c240_44, %c0_45] : memref<720x1xf32, #tpu.memory_space<vmem>>, vector<32x1xf32>
    %c272_46 = arith.constant 272 : index
    %c0_47 = arith.constant 0 : index
    %67 = vector.load %arg3[%c272_46, %c0_47] : memref<720x1xf32, #tpu.memory_space<vmem>>, vector<32x1xf32>
    %c304_48 = arith.constant 304 : index
    %c0_49 = arith.constant 0 : index
    %68 = vector.load %arg3[%c304_48, %c0_49] : memref<720x1xf32, #tpu.memory_space<vmem>>, vector<32x1xf32>
    %c336_50 = arith.constant 336 : index
    %c0_51 = arith.constant 0 : index
    %69 = vector.load %arg3[%c336_50, %c0_51] : memref<720x1xf32, #tpu.memory_space<vmem>>, vector<24x1xf32>
    %cst_52 = arith.constant dense<0.000000e+00> : vector<32x128xf32>
    %70 = tpu.matmul %62, %59, %cst_52 {dimension_numbers = #tpu.dot_dimension_numbers<[1], [0], [0], [1], [0, 0, 1, 1], [], []>} : vector<32x16xf32>, vector<16x128xf32>, vector<32x128xf32> -> vector<32x128xf32>
    %71 = vector.broadcast %66 : vector<32x1xf32> to vector<32x128xf32>
    %72 = arith.addf %70, %71 : vector<32x128xf32>
    %cst_53 = arith.constant 0.000000e+00 : f32
    %73 = vector.broadcast %cst_53 : f32 to vector<32x128xf32>
    %74 = arith.maximumf %72, %73 : vector<32x128xf32>
    %cst_54 = arith.constant dense<0.000000e+00> : vector<32x128xf32>
    %75 = tpu.matmul %63, %74, %cst_54 {dimension_numbers = #tpu.dot_dimension_numbers<[1], [0], [0], [1], [0, 0, 1, 1], [], []>} : vector<32x32xf32>, vector<32x128xf32>, vector<32x128xf32> -> vector<32x128xf32>
    %76 = vector.broadcast %67 : vector<32x1xf32> to vector<32x128xf32>
    %77 = arith.addf %75, %76 : vector<32x128xf32>
    %cst_55 = arith.constant 0.000000e+00 : f32
    %78 = vector.broadcast %cst_55 : f32 to vector<32x128xf32>
    %79 = arith.maximumf %77, %78 : vector<32x128xf32>
    %cst_56 = arith.constant dense<0.000000e+00> : vector<32x128xf32>
    %80 = tpu.matmul %64, %79, %cst_56 {dimension_numbers = #tpu.dot_dimension_numbers<[1], [0], [0], [1], [0, 0, 1, 1], [], []>} : vector<32x32xf32>, vector<32x128xf32>, vector<32x128xf32> -> vector<32x128xf32>
    %81 = vector.broadcast %68 : vector<32x1xf32> to vector<32x128xf32>
    %82 = arith.addf %80, %81 : vector<32x128xf32>
    %cst_57 = arith.constant 0.000000e+00 : f32
    %83 = vector.broadcast %cst_57 : f32 to vector<32x128xf32>
    %84 = arith.maximumf %82, %83 : vector<32x128xf32>
    %cst_58 = arith.constant dense<0.000000e+00> : vector<24x128xf32>
    %85 = tpu.matmul %65, %84, %cst_58 {dimension_numbers = #tpu.dot_dimension_numbers<[1], [0], [0], [1], [0, 0, 1, 1], [], []>} : vector<24x32xf32>, vector<32x128xf32>, vector<24x128xf32> -> vector<24x128xf32>
    %86 = vector.broadcast %69 : vector<24x1xf32> to vector<24x128xf32>
    %87 = arith.addf %85, %86 : vector<24x128xf32>
    %88 = vector.extract_strided_slice %87 {offsets = [0, 0], sizes = [16, 128], strides = [1, 1]} : vector<24x128xf32> to vector<16x128xf32>
    %89 = arith.addf %59, %88 : vector<16x128xf32>
    %90 = vector.extract_strided_slice %87 {offsets = [16, 0], sizes = [8, 128], strides = [1, 1]} : vector<24x128xf32> to vector<8x128xf32>
    %91 = arith.addf %61, %90 : vector<8x128xf32>
    %c360 = arith.constant 360 : index
    %c0_59 = arith.constant 0 : index
    %92 = vector.load %arg2[%c360, %c0_59] : memref<720x32xf32, #tpu.memory_space<vmem>>, vector<32x16xf32>
    %c392 = arith.constant 392 : index
    %c0_60 = arith.constant 0 : index
    %93 = vector.load %arg2[%c392, %c0_60] : memref<720x32xf32, #tpu.memory_space<vmem>>, vector<32x32xf32>
    %c424 = arith.constant 424 : index
    %c0_61 = arith.constant 0 : index
    %94 = vector.load %arg2[%c424, %c0_61] : memref<720x32xf32, #tpu.memory_space<vmem>>, vector<32x32xf32>
    %c456 = arith.constant 456 : index
    %c0_62 = arith.constant 0 : index
    %95 = vector.load %arg2[%c456, %c0_62] : memref<720x32xf32, #tpu.memory_space<vmem>>, vector<24x32xf32>
    %c360_63 = arith.constant 360 : index
    %c0_64 = arith.constant 0 : index
    %96 = vector.load %arg3[%c360_63, %c0_64] : memref<720x1xf32, #tpu.memory_space<vmem>>, vector<32x1xf32>
    %c392_65 = arith.constant 392 : index
    %c0_66 = arith.constant 0 : index
    %97 = vector.load %arg3[%c392_65, %c0_66] : memref<720x1xf32, #tpu.memory_space<vmem>>, vector<32x1xf32>
    %c424_67 = arith.constant 424 : index
    %c0_68 = arith.constant 0 : index
    %98 = vector.load %arg3[%c424_67, %c0_68] : memref<720x1xf32, #tpu.memory_space<vmem>>, vector<32x1xf32>
    %c456_69 = arith.constant 456 : index
    %c0_70 = arith.constant 0 : index
    %99 = vector.load %arg3[%c456_69, %c0_70] : memref<720x1xf32, #tpu.memory_space<vmem>>, vector<24x1xf32>
    %cst_71 = arith.constant dense<0.000000e+00> : vector<32x128xf32>
    %100 = tpu.matmul %92, %89, %cst_71 {dimension_numbers = #tpu.dot_dimension_numbers<[1], [0], [0], [1], [0, 0, 1, 1], [], []>} : vector<32x16xf32>, vector<16x128xf32>, vector<32x128xf32> -> vector<32x128xf32>
    %101 = vector.broadcast %96 : vector<32x1xf32> to vector<32x128xf32>
    %102 = arith.addf %100, %101 : vector<32x128xf32>
    %cst_72 = arith.constant 0.000000e+00 : f32
    %103 = vector.broadcast %cst_72 : f32 to vector<32x128xf32>
    %104 = arith.maximumf %102, %103 : vector<32x128xf32>
    %cst_73 = arith.constant dense<0.000000e+00> : vector<32x128xf32>
    %105 = tpu.matmul %93, %104, %cst_73 {dimension_numbers = #tpu.dot_dimension_numbers<[1], [0], [0], [1], [0, 0, 1, 1], [], []>} : vector<32x32xf32>, vector<32x128xf32>, vector<32x128xf32> -> vector<32x128xf32>
    %106 = vector.broadcast %97 : vector<32x1xf32> to vector<32x128xf32>
    %107 = arith.addf %105, %106 : vector<32x128xf32>
    %cst_74 = arith.constant 0.000000e+00 : f32
    %108 = vector.broadcast %cst_74 : f32 to vector<32x128xf32>
    %109 = arith.maximumf %107, %108 : vector<32x128xf32>
    %cst_75 = arith.constant dense<0.000000e+00> : vector<32x128xf32>
    %110 = tpu.matmul %94, %109, %cst_75 {dimension_numbers = #tpu.dot_dimension_numbers<[1], [0], [0], [1], [0, 0, 1, 1], [], []>} : vector<32x32xf32>, vector<32x128xf32>, vector<32x128xf32> -> vector<32x128xf32>
    %111 = vector.broadcast %98 : vector<32x1xf32> to vector<32x128xf32>
    %112 = arith.addf %110, %111 : vector<32x128xf32>
    %cst_76 = arith.constant 0.000000e+00 : f32
    %113 = vector.broadcast %cst_76 : f32 to vector<32x128xf32>
    %114 = arith.maximumf %112, %113 : vector<32x128xf32>
    %cst_77 = arith.constant dense<0.000000e+00> : vector<24x128xf32>
    %115 = tpu.matmul %95, %114, %cst_77 {dimension_numbers = #tpu.dot_dimension_numbers<[1], [0], [0], [1], [0, 0, 1, 1], [], []>} : vector<24x32xf32>, vector<32x128xf32>, vector<24x128xf32> -> vector<24x128xf32>
    %116 = vector.broadcast %99 : vector<24x1xf32> to vector<24x128xf32>
    %117 = arith.addf %115, %116 : vector<24x128xf32>
    %118 = vector.extract_strided_slice %117 {offsets = [0, 0], sizes = [16, 128], strides = [1, 1]} : vector<24x128xf32> to vector<16x128xf32>
    %119 = arith.addf %89, %118 : vector<16x128xf32>
    %120 = vector.extract_strided_slice %117 {offsets = [16, 0], sizes = [8, 128], strides = [1, 1]} : vector<24x128xf32> to vector<8x128xf32>
    %121 = arith.addf %91, %120 : vector<8x128xf32>
    %c480 = arith.constant 480 : index
    %c0_78 = arith.constant 0 : index
    %122 = vector.load %arg2[%c480, %c0_78] : memref<720x32xf32, #tpu.memory_space<vmem>>, vector<32x16xf32>
    %c512 = arith.constant 512 : index
    %c0_79 = arith.constant 0 : index
    %123 = vector.load %arg2[%c512, %c0_79] : memref<720x32xf32, #tpu.memory_space<vmem>>, vector<32x32xf32>
    %c544 = arith.constant 544 : index
    %c0_80 = arith.constant 0 : index
    %124 = vector.load %arg2[%c544, %c0_80] : memref<720x32xf32, #tpu.memory_space<vmem>>, vector<32x32xf32>
    %c576 = arith.constant 576 : index
    %c0_81 = arith.constant 0 : index
    %125 = vector.load %arg2[%c576, %c0_81] : memref<720x32xf32, #tpu.memory_space<vmem>>, vector<24x32xf32>
    %c480_82 = arith.constant 480 : index
    %c0_83 = arith.constant 0 : index
    %126 = vector.load %arg3[%c480_82, %c0_83] : memref<720x1xf32, #tpu.memory_space<vmem>>, vector<32x1xf32>
    %c512_84 = arith.constant 512 : index
    %c0_85 = arith.constant 0 : index
    %127 = vector.load %arg3[%c512_84, %c0_85] : memref<720x1xf32, #tpu.memory_space<vmem>>, vector<32x1xf32>
    %c544_86 = arith.constant 544 : index
    %c0_87 = arith.constant 0 : index
    %128 = vector.load %arg3[%c544_86, %c0_87] : memref<720x1xf32, #tpu.memory_space<vmem>>, vector<32x1xf32>
    %c576_88 = arith.constant 576 : index
    %c0_89 = arith.constant 0 : index
    %129 = vector.load %arg3[%c576_88, %c0_89] : memref<720x1xf32, #tpu.memory_space<vmem>>, vector<24x1xf32>
    %cst_90 = arith.constant dense<0.000000e+00> : vector<32x128xf32>
    %130 = tpu.matmul %122, %119, %cst_90 {dimension_numbers = #tpu.dot_dimension_numbers<[1], [0], [0], [1], [0, 0, 1, 1], [], []>} : vector<32x16xf32>, vector<16x128xf32>, vector<32x128xf32> -> vector<32x128xf32>
    %131 = vector.broadcast %126 : vector<32x1xf32> to vector<32x128xf32>
    %132 = arith.addf %130, %131 : vector<32x128xf32>
    %cst_91 = arith.constant 0.000000e+00 : f32
    %133 = vector.broadcast %cst_91 : f32 to vector<32x128xf32>
    %134 = arith.maximumf %132, %133 : vector<32x128xf32>
    %cst_92 = arith.constant dense<0.000000e+00> : vector<32x128xf32>
    %135 = tpu.matmul %123, %134, %cst_92 {dimension_numbers = #tpu.dot_dimension_numbers<[1], [0], [0], [1], [0, 0, 1, 1], [], []>} : vector<32x32xf32>, vector<32x128xf32>, vector<32x128xf32> -> vector<32x128xf32>
    %136 = vector.broadcast %127 : vector<32x1xf32> to vector<32x128xf32>
    %137 = arith.addf %135, %136 : vector<32x128xf32>
    %cst_93 = arith.constant 0.000000e+00 : f32
    %138 = vector.broadcast %cst_93 : f32 to vector<32x128xf32>
    %139 = arith.maximumf %137, %138 : vector<32x128xf32>
    %cst_94 = arith.constant dense<0.000000e+00> : vector<32x128xf32>
    %140 = tpu.matmul %124, %139, %cst_94 {dimension_numbers = #tpu.dot_dimension_numbers<[1], [0], [0], [1], [0, 0, 1, 1], [], []>} : vector<32x32xf32>, vector<32x128xf32>, vector<32x128xf32> -> vector<32x128xf32>
    %141 = vector.broadcast %128 : vector<32x1xf32> to vector<32x128xf32>
    %142 = arith.addf %140, %141 : vector<32x128xf32>
    %cst_95 = arith.constant 0.000000e+00 : f32
    %143 = vector.broadcast %cst_95 : f32 to vector<32x128xf32>
    %144 = arith.maximumf %142, %143 : vector<32x128xf32>
    %cst_96 = arith.constant dense<0.000000e+00> : vector<24x128xf32>
    %145 = tpu.matmul %125, %144, %cst_96 {dimension_numbers = #tpu.dot_dimension_numbers<[1], [0], [0], [1], [0, 0, 1, 1], [], []>} : vector<24x32xf32>, vector<32x128xf32>, vector<24x128xf32> -> vector<24x128xf32>
    %146 = vector.broadcast %129 : vector<24x1xf32> to vector<24x128xf32>
    %147 = arith.addf %145, %146 : vector<24x128xf32>
    %148 = vector.extract_strided_slice %147 {offsets = [0, 0], sizes = [16, 128], strides = [1, 1]} : vector<24x128xf32> to vector<16x128xf32>
    %149 = arith.addf %119, %148 : vector<16x128xf32>
    %150 = vector.extract_strided_slice %147 {offsets = [16, 0], sizes = [8, 128], strides = [1, 1]} : vector<24x128xf32> to vector<8x128xf32>
    %151 = arith.addf %121, %150 : vector<8x128xf32>
    %c600 = arith.constant 600 : index
    %c0_97 = arith.constant 0 : index
    %152 = vector.load %arg2[%c600, %c0_97] : memref<720x32xf32, #tpu.memory_space<vmem>>, vector<32x16xf32>
    %c632 = arith.constant 632 : index
    %c0_98 = arith.constant 0 : index
    %153 = vector.load %arg2[%c632, %c0_98] : memref<720x32xf32, #tpu.memory_space<vmem>>, vector<32x32xf32>
    %c664 = arith.constant 664 : index
    %c0_99 = arith.constant 0 : index
    %154 = vector.load %arg2[%c664, %c0_99] : memref<720x32xf32, #tpu.memory_space<vmem>>, vector<32x32xf32>
    %c696 = arith.constant 696 : index
    %c0_100 = arith.constant 0 : index
    %155 = vector.load %arg2[%c696, %c0_100] : memref<720x32xf32, #tpu.memory_space<vmem>>, vector<24x32xf32>
    %c600_101 = arith.constant 600 : index
    %c0_102 = arith.constant 0 : index
    %156 = vector.load %arg3[%c600_101, %c0_102] : memref<720x1xf32, #tpu.memory_space<vmem>>, vector<32x1xf32>
    %c632_103 = arith.constant 632 : index
    %c0_104 = arith.constant 0 : index
    %157 = vector.load %arg3[%c632_103, %c0_104] : memref<720x1xf32, #tpu.memory_space<vmem>>, vector<32x1xf32>
    %c664_105 = arith.constant 664 : index
    %c0_106 = arith.constant 0 : index
    %158 = vector.load %arg3[%c664_105, %c0_106] : memref<720x1xf32, #tpu.memory_space<vmem>>, vector<32x1xf32>
    %c696_107 = arith.constant 696 : index
    %c0_108 = arith.constant 0 : index
    %159 = vector.load %arg3[%c696_107, %c0_108] : memref<720x1xf32, #tpu.memory_space<vmem>>, vector<24x1xf32>
    %cst_109 = arith.constant dense<0.000000e+00> : vector<32x128xf32>
    %160 = tpu.matmul %152, %149, %cst_109 {dimension_numbers = #tpu.dot_dimension_numbers<[1], [0], [0], [1], [0, 0, 1, 1], [], []>} : vector<32x16xf32>, vector<16x128xf32>, vector<32x128xf32> -> vector<32x128xf32>
    %161 = vector.broadcast %156 : vector<32x1xf32> to vector<32x128xf32>
    %162 = arith.addf %160, %161 : vector<32x128xf32>
    %cst_110 = arith.constant 0.000000e+00 : f32
    %163 = vector.broadcast %cst_110 : f32 to vector<32x128xf32>
    %164 = arith.maximumf %162, %163 : vector<32x128xf32>
    %cst_111 = arith.constant dense<0.000000e+00> : vector<32x128xf32>
    %165 = tpu.matmul %153, %164, %cst_111 {dimension_numbers = #tpu.dot_dimension_numbers<[1], [0], [0], [1], [0, 0, 1, 1], [], []>} : vector<32x32xf32>, vector<32x128xf32>, vector<32x128xf32> -> vector<32x128xf32>
    %166 = vector.broadcast %157 : vector<32x1xf32> to vector<32x128xf32>
    %167 = arith.addf %165, %166 : vector<32x128xf32>
    %cst_112 = arith.constant 0.000000e+00 : f32
    %168 = vector.broadcast %cst_112 : f32 to vector<32x128xf32>
    %169 = arith.maximumf %167, %168 : vector<32x128xf32>
    %cst_113 = arith.constant dense<0.000000e+00> : vector<32x128xf32>
    %170 = tpu.matmul %154, %169, %cst_113 {dimension_numbers = #tpu.dot_dimension_numbers<[1], [0], [0], [1], [0, 0, 1, 1], [], []>} : vector<32x32xf32>, vector<32x128xf32>, vector<32x128xf32> -> vector<32x128xf32>
    %171 = vector.broadcast %158 : vector<32x1xf32> to vector<32x128xf32>
    %172 = arith.addf %170, %171 : vector<32x128xf32>
    %cst_114 = arith.constant 0.000000e+00 : f32
    %173 = vector.broadcast %cst_114 : f32 to vector<32x128xf32>
    %174 = arith.maximumf %172, %173 : vector<32x128xf32>
    %cst_115 = arith.constant dense<0.000000e+00> : vector<24x128xf32>
    %175 = tpu.matmul %155, %174, %cst_115 {dimension_numbers = #tpu.dot_dimension_numbers<[1], [0], [0], [1], [0, 0, 1, 1], [], []>} : vector<24x32xf32>, vector<32x128xf32>, vector<24x128xf32> -> vector<24x128xf32>
    %176 = vector.broadcast %159 : vector<24x1xf32> to vector<24x128xf32>
    %177 = arith.addf %175, %176 : vector<24x128xf32>
    %178 = vector.extract_strided_slice %177 {offsets = [0, 0], sizes = [16, 128], strides = [1, 1]} : vector<24x128xf32> to vector<16x128xf32>
    %179 = arith.addf %149, %178 : vector<16x128xf32>
    %180 = vector.extract_strided_slice %177 {offsets = [16, 0], sizes = [8, 128], strides = [1, 1]} : vector<24x128xf32> to vector<8x128xf32>
    %181 = arith.addf %151, %180 : vector<8x128xf32>
    %c0_116 = arith.constant 0 : index
    %c0_117 = arith.constant 0 : index
    %182 = vector.load %arg4[%c0_116, %c0_117] : memref<16x128xf32, #tpu.memory_space<vmem>>, vector<16x128xf32>
    tpu.vector_store %arg4[%c0_116, %c0_117], %179 {strides = array<i32>} : memref<16x128xf32, #tpu.memory_space<vmem>>, vector<16x128xf32>,
    %c0_118 = arith.constant 0 : index
    %c0_119 = arith.constant 0 : index
    %183 = vector.load %arg5[%c0_118, %c0_119] : memref<8x128xf32, #tpu.memory_space<vmem>>, vector<8x128xf32>
    tpu.vector_store %arg5[%c0_118, %c0_119], %181 {strides = array<i32>} : memref<8x128xf32, #tpu.memory_space<vmem>>, vector<8x128xf32>,
    return
  }
  func.func @transform_0(%arg0: i32) -> (i32, i32) {
    %c0_i32 = arith.constant 0 : i32
    %c0_i32_0 = arith.constant 0 : i32
    return %c0_i32, %arg0 : i32, i32
  }
  func.func @transform_1(%arg0: i32) -> (i32, i32) {
    %c0_i32 = arith.constant 0 : i32
    %c0_i32_0 = arith.constant 0 : i32
    %c0_i32_1 = arith.constant 0 : i32
    return %c0_i32, %c0_i32_0 : i32, i32
  }
  func.func @transform_2(%arg0: i32) -> (i32, i32) {
    %c0_i32 = arith.constant 0 : i32
    %c0_i32_0 = arith.constant 0 : i32
    %c0_i32_1 = arith.constant 0 : i32
    return %c0_i32, %c0_i32_0 : i32, i32
  }
  func.func @transform_3(%arg0: i32) -> (i32, i32) {
    %c0_i32 = arith.constant 0 : i32
    %c0_i32_0 = arith.constant 0 : i32
    return %c0_i32, %arg0 : i32, i32
  }
  func.func @transform_4(%arg0: i32) -> (i32, i32) {
    %c0_i32 = arith.constant 0 : i32
    %c0_i32_0 = arith.constant 0 : i32
    return %c0_i32, %arg0 : i32, i32
  }
}

</mosaic_0001>

<bundles_post_ra>
// kernel: neg.2
= control target key start
LH: loop header
LB: loop body
LE: loop exit
PB: predicated region body
PF: predicated region fallthrough
CT: control target
= control target key end

     0   :  { %s200_s0 = inlined_call_operand.vmem [shape: f32[6,32,16], index: 0, kind: input, shape index: {}]   ;;  %s201_s1 = inlined_call_operand.vmem [shape: f32[6,32,16], index: 1, kind: output, shape index: {}]  }
   0x1   :  { %v2_v0 = vld [vmem:[%s200_s0] sm:$0xff]  ;;  %v96_v1 = vld [vmem:[%s200_s0 + $0x10] sm:$0xff]  ;;  %v106_v12 = vld [vmem:[%s200_s0 + $0x8] sm:$0xff] }
   0x2   :  { %v98_v2 = vld [vmem:[%s200_s0 + $0x20] sm:$0xff]  ;;  %v5_v3 = vxor.u32 2147483648, %v2_v0  ;;  %v12_v4 = vxor.u32 2147483648, %v96_v1  ;;  %v100_v6 = vld [vmem:[%s200_s0 + $0x30] sm:$0xff]  ;;  %v108_v13 = vld [vmem:[%s200_s0 + $0x18] sm:$0xff]  ;;  %v52_v15 = vxor.u32 2147483648, %v106_v12 }
   0x3   :  { %v20_v5 = vxor.u32 2147483648, %v98_v2  ;;  %v102_v7 = vld [vmem:[%s200_s0 + $0x40] sm:$0xff]  ;;  %v104_v8 = vld [vmem:[%s200_s0 + $0x50] sm:$0xff]  ;;  %v28_v9 = vxor.u32 2147483648, %v100_v6  ;;  %v110_v14 = vld [vmem:[%s200_s0 + $0x28] sm:$0xff]  ;;  %v60_v16 = vxor.u32 2147483648, %v108_v13 }
   0x4   :  { %v36_v10 = vxor.u32 2147483648, %v102_v7  ;;  %v44_v11 = vxor.u32 2147483648, %v104_v8  ;;  %7 = vst [vmem:[%s201_s1] sm:$0xff] %v5_v3  ;;  %97 = vst [vmem:[%s201_s1 + $0x10] sm:$0xff] %v12_v4  ;;  %v68_v17 = vxor.u32 2147483648, %v110_v14  ;;  %v112_v18 = vld [vmem:[%s200_s0 + $0x38] sm:$0xff]  ;;  %v114_v19 = vld [vmem:[%s200_s0 + $0x48] sm:$0xff] }
   0x5   :  { %99 = vst [vmem:[%s201_s1 + $0x20] sm:$0xff] %v20_v5  ;;  %v116_v20 = vld [vmem:[%s200_s0 + $0x58] sm:$0xff]  ;;  %101 = vst [vmem:[%s201_s1 + $0x30] sm:$0xff] %v28_v9  ;;  %v76_v21 = vxor.u32 2147483648, %v112_v18  ;;  %v84_v22 = vxor.u32 2147483648, %v114_v19 }
   0x6   :  { %103 = vst [vmem:[%s201_s1 + $0x40] sm:$0xff] %v36_v10  ;;  %105 = vst [vmem:[%s201_s1 + $0x50] sm:$0xff] %v44_v11  ;;  %v92_v23 = vxor.u32 2147483648, %v116_v20 }
   0x7   :  { %107 = vst [vmem:[%s201_s1 + $0x8] sm:$0xff] %v52_v15  ;;  %109 = vst [vmem:[%s201_s1 + $0x18] sm:$0xff] %v60_v16 }
   0x8   :  { %111 = vst [vmem:[%s201_s1 + $0x28] sm:$0xff] %v68_v17  ;;  %113 = vst [vmem:[%s201_s1 + $0x38] sm:$0xff] %v76_v21 }
   0x9   :  { %115 = vst [vmem:[%s201_s1 + $0x48] sm:$0xff] %v84_v22  ;;  %117 = vst [vmem:[%s201_s1 + $0x58] sm:$0xff] %v92_v23 }

// kernel: nbeats_forward.1
= control target key start
LH: loop header
LB: loop body
LE: loop exit
PB: predicated region body
PF: predicated region fallthrough
CT: control target
= control target key end

     0   :  { %v3803_v0 = vmov 0   ;;  %vm68_vm0 = vcmask 130048   ;;  %vm190_vm1 = vcmask 261120   ;;  %vm3805_vm2 = vmmov 0   ;;  %s4573_s2 = inlined_call_operand.vmem [shape: f32[720,1], index: 2, kind: input, shape index: {}]   ;;  %s4574_s0 = inlined_call_operand.vmem [shape: f32[16,128], index: 0, kind: input, shape index: {}]   ;;  %s4575_s1 = inlined_call_operand.vmem [shape: f32[720,32], index: 1, kind: input, shape index: {}]   ;;  %s4576_s3 = inlined_call_operand.vmem [shape: f32[16,128], index: 3, kind: output, shape index: {0}]   ;;  %s4577_s4 = inlined_call_operand.vmem [shape: f32[8,128], index: 4, kind: output, shape index: {1}]  }
   0x1   :  { %3802 = vset.pattern.permute.xlu1 %v3803_v0  ;;  %3801 = vset.pattern.permute.xlu0 %v3803_v0  ;;  %v35_v1 = vld [vmem:[%s4573_s2 + $0x10] sm:$0xff]  ;;  %v33_v2 = vld [vmem:[%s4573_s2] sm:$0xff]  ;;  %v3846_v4 = vld [vmem:[%s4574_s0 + $0x8] sm:$0xff] }
   0x2   :  { %v3841_v3 = vld [vmem:[%s4574_s0] sm:$0xff]  ;;  %60 = vperm.xlu1 %3802, %v35_v1   ;;  %50 = vperm.xlu0 %3801, %v33_v2   ;;  %v36_v6 = vld [vmem:[%s4573_s2 + $0x18] sm:$0xff]  ;;  %v34_v8 = vld [vmem:[%s4573_s2 + $0x8] sm:$0xff] }
   0x3   :  { %v3625_v5 = vpack.c.bf16 %v3846_v4, %v3841_v3  ;;  %v18_v7 = vld [vmem:[%s4575_s1] sm:$0xff]  ;;  %v19_v9 = vld [vmem:[%s4575_s1 + $0x8] sm:$0xff]  ;;  %v20_v11 = vld [vmem:[%s4575_s1 + $0x10] sm:$0xff] }
   0x4   :  { %3299 = vmatprep.mubr.msk.f32.mxu0 %vm68_vm0, %v18_v7  ;;  %v38_v10 = vld [vmem:[%s4573_s2 + $0x28] sm:$0xff]  ;;  %v37_v12 = vld [vmem:[%s4573_s2 + $0x20] sm:$0xff]  ;;  %v21_v13 = vld [vmem:[%s4575_s1 + $0x18] sm:$0xff] }
   0x5   :  { %3626 = vmatprep.subr.bf16.mxu0 %v3625_v5  ;;  %v40_v14 = vld [vmem:[%s4573_s2 + $0x38] sm:$0xff]  ;;  %v39_v15 = vld [vmem:[%s4573_s2 + $0x30] sm:$0xff]  ;;  %v42_v16 = vld [vmem:[%s4573_s2 + $0x48] sm:$0xff] }
   0x6   :  { %3628 = vmatpush3.bf16.msra.mxu0 %v3625_v5  ;;  %65 = vperm.xlu1 %3802, %v36_v6   ;;  %v41_v17 = vld [vmem:[%s4573_s2 + $0x40] sm:$0xff]  ;;  %v44_v18 = vld [vmem:[%s4573_s2 + $0x58] sm:$0xff]  ;;  %v43_v19 = vld [vmem:[%s4573_s2 + $0x50] sm:$0xff] }
   0x7   :  { %55 = vperm.xlu0 %3801, %v34_v8   ;;  %v46_v20 = vld [vmem:[%s4573_s2 + $0x68] sm:$0xff]  ;;  %v45_v21 = vld [vmem:[%s4573_s2 + $0x60] sm:$0xff]  ;;  %v535_v23 = vld [vmem:[%s4573_s2 + $0x78] sm:$0xff] }
   0x8   :  { %v536_v22 = vld [vmem:[%s4573_s2 + $0x80] sm:$0xff]  ;;  %v538_v24 = vld [vmem:[%s4573_s2 + $0x90] sm:$0xff]  ;;  %v537_v25 = vld [vmem:[%s4573_s2 + $0x88] sm:$0xff] }
   0x9   :  { %3300 = vmatmul.mubr.msk.f32.vlgmr.msra.gmra.mrb[0].mxu0 %vm68_vm0, %v19_v9  ;;  %v540_v26 = vld [vmem:[%s4573_s2 + $0xa0] sm:$0xff]  ;;  %v539_v27 = vld [vmem:[%s4573_s2 + $0x98] sm:$0xff]  ;;  %v542_v28 = vld [vmem:[%s4573_s2 + $0xb0] sm:$0xff] }
   0xa   :  { %177 = vperm.xlu1 %3802, %v38_v10   ;;  %3302 = vmatprep.mubr.msk.f32.mxu0 %vm68_vm0, %v20_v11  ;;  %v541_v29 = vld [vmem:[%s4573_s2 + $0xa8] sm:$0xff]  ;;  %v544_v30 = vld [vmem:[%s4573_s2 + $0xc0] sm:$0xff]  ;;  %v543_v31 = vld [vmem:[%s4573_s2 + $0xb8] sm:$0xff] }
   0xb   :  { %172 = vperm.xlu0 %3801, %v37_v12   ;;  %v546_v32 = vld [vmem:[%s4573_s2 + $0xd0] sm:$0xff]  ;;  %v545_v33 = vld [vmem:[%s4573_s2 + $0xc8] sm:$0xff]  ;;  %v548_v34 = vld [vmem:[%s4573_s2 + $0xe0] sm:$0xff] }
   0xc   :  { %v547_v35 = vld [vmem:[%s4573_s2 + $0xd8] sm:$0xff]  ;;  %v1035_v37 = vld [vmem:[%s4573_s2 + $0xf0] sm:$0xff]  ;;  %v1038_v38 = vld [vmem:[%s4573_s2 + $0x108] sm:$0xff] }
   0xd   :  { %3303 = vmatmul.mubr.msk.f32.gmra.mrb[2].mxu0 %vm68_vm0, %v21_v13  ;;  %v1036_v36 = vld [vmem:[%s4573_s2 + $0xf8] sm:$0xff]  ;;  %v1037_v39 = vld [vmem:[%s4573_s2 + $0x100] sm:$0xff]  ;;  %v1039_v41 = vld [vmem:[%s4573_s2 + $0x110] sm:$0xff] }
   0xe   :  { %187 = vperm.xlu1 %3802, %v40_v14   ;;  %v1040_v40 = vld [vmem:[%s4573_s2 + $0x118] sm:$0xff]  ;;  %v1042_v42 = vld [vmem:[%s4573_s2 + $0x128] sm:$0xff]  ;;  %v1041_v43 = vld [vmem:[%s4573_s2 + $0x120] sm:$0xff] }
   0xf   :  { %182 = vperm.xlu0 %3801, %v39_v15   ;;  %v1044_v44 = vld [vmem:[%s4573_s2 + $0x138] sm:$0xff]  ;;  %v1043_v45 = vld [vmem:[%s4573_s2 + $0x130] sm:$0xff]  ;;  %v1046_v46 = vld [vmem:[%s4573_s2 + $0x148] sm:$0xff] }
  0x10   :  { %v1045_v47 = vld [vmem:[%s4573_s2 + $0x140] sm:$0xff]  ;;  %v1048_v48 = vld [vmem:[%s4573_s2 + $0x158] sm:$0xff]  ;;  %v1047_v49 = vld [vmem:[%s4573_s2 + $0x150] sm:$0xff] }
  0x11   :  { %v1536_v50 = vld [vmem:[%s4573_s2 + $0x170] sm:$0xff]  ;;  %v1535_v51 = vld [vmem:[%s4573_s2 + $0x168] sm:$0xff]  ;;  %v1538_v52 = vld [vmem:[%s4573_s2 + $0x180] sm:$0xff] }
  0x12   :  { %299 = vperm.xlu1 %3802, %v42_v16   ;;  %v1537_v53 = vld [vmem:[%s4573_s2 + $0x178] sm:$0xff]  ;;  %v1540_v54 = vld [vmem:[%s4573_s2 + $0x190] sm:$0xff]  ;;  %v1539_v55 = vld [vmem:[%s4573_s2 + $0x188] sm:$0xff] }
  0x13   :  { %294 = vperm.xlu0 %3801, %v41_v17   ;;  %v1542_v56 = vld [vmem:[%s4573_s2 + $0x1a0] sm:$0xff]  ;;  %v1541_v57 = vld [vmem:[%s4573_s2 + $0x198] sm:$0xff]  ;;  %v1544_v58 = vld [vmem:[%s4573_s2 + $0x1b0] sm:$0xff] }
  0x14   :  { %v1543_v59 = vld [vmem:[%s4573_s2 + $0x1a8] sm:$0xff]  ;;  %v1546_v60 = vld [vmem:[%s4573_s2 + $0x1c0] sm:$0xff]  ;;  %v1545_v61 = vld [vmem:[%s4573_s2 + $0x1b8] sm:$0xff] }
  0x15   :  { %v22_v62 = vld [vmem:[%s4575_s1 + $0x20] sm:$0xff]  ;;  %v1548_v63 = vld [vmem:[%s4573_s2 + $0x1d0] sm:$0xff]  ;;  %v1547_v0 = vld [vmem:[%s4573_s2 + $0x1c8] sm:$0xff] }
  0x16   :  { %309 = vperm.xlu1 %3802, %v44_v18   ;;  %3313 = vmatprep.mubr.msk.f32.mxu0 %vm190_vm1, %v22_v62  ;;  %v2036_v1 = vld [vmem:[%s4573_s2 + $0x1e8] sm:$0xff]  ;;  %v2035_v2 = vld [vmem:[%s4573_s2 + $0x1e0] sm:$0xff]  ;;  %v2038_v5 = vld [vmem:[%s4573_s2 + $0x1f8] sm:$0xff] }
  0x17   :  { %304 = vperm.xlu0 %3801, %v43_v19   ;;  %v2037_v6 = vld [vmem:[%s4573_s2 + $0x1f0] sm:$0xff]  ;;  %v2040_v7 = vld [vmem:[%s4573_s2 + $0x208] sm:$0xff]  ;;  %v2039_v8 = vld [vmem:[%s4573_s2 + $0x200] sm:$0xff] }
  0x18   :  { %v2042_v9 = vld [vmem:[%s4573_s2 + $0x218] sm:$0xff]  ;;  %v2041_v10 = vld [vmem:[%s4573_s2 + $0x210] sm:$0xff]  ;;  %v2044_v11 = vld [vmem:[%s4573_s2 + $0x228] sm:$0xff] }
  0x19   :  { %v2043_v12 = vld [vmem:[%s4573_s2 + $0x220] sm:$0xff]  ;;  %v2046_v13 = vld [vmem:[%s4573_s2 + $0x238] sm:$0xff]  ;;  %v2045_v14 = vld [vmem:[%s4573_s2 + $0x230] sm:$0xff] }
  0x1a   :  { %420 = vperm.xlu1 %3802, %v46_v20   ;;  %v2048_v15 = vld [vmem:[%s4573_s2 + $0x248] sm:$0xff]  ;;  %v2047_v16 = vld [vmem:[%s4573_s2 + $0x240] sm:$0xff]  ;;  %v2535_v18 = vld [vmem:[%s4573_s2 + $0x258] sm:$0xff] }
  0x1b   :  { %415 = vperm.xlu0 %3801, %v45_v21   ;;  %v2536_v17 = vld [vmem:[%s4573_s2 + $0x260] sm:$0xff]  ;;  %v2538_v19 = vld [vmem:[%s4573_s2 + $0x270] sm:$0xff]  ;;  %v2537_v20 = vld [vmem:[%s4573_s2 + $0x268] sm:$0xff] }
  0x1c   :  { %v2540_v21 = vld [vmem:[%s4573_s2 + $0x280] sm:$0xff] }
  0x1e   :  { %557 = vperm.xlu1 %3802, %v536_v22   ;;  %v2539_v22 = vld [vmem:[%s4573_s2 + $0x278] sm:$0xff] }
  0x1f   :  { %552 = vperm.xlu0 %3801, %v535_v23   ;;  %v2542_v23 = vld [vmem:[%s4573_s2 + $0x290] sm:$0xff] }
  0x22   :  { %567 = vperm.xlu1 %3802, %v538_v24   ;;  %v2541_v24 = vld [vmem:[%s4573_s2 + $0x288] sm:$0xff] }
  0x23   :  { %562 = vperm.xlu0 %3801, %v537_v25   ;;  %v2544_v25 = vld [vmem:[%s4573_s2 + $0x2a0] sm:$0xff] }
  0x26   :  { %678 = vperm.xlu1 %3802, %v540_v26   ;;  %v2543_v26 = vld [vmem:[%s4573_s2 + $0x298] sm:$0xff] }
  0x27   :  { %673 = vperm.xlu0 %3801, %v539_v27   ;;  %v2546_v27 = vld [vmem:[%s4573_s2 + $0x2b0] sm:$0xff] }
  0x2a   :  { %688 = vperm.xlu1 %3802, %v542_v28   ;;  %v2545_v28 = vld [vmem:[%s4573_s2 + $0x2a8] sm:$0xff] }
  0x2b   :  { %683 = vperm.xlu0 %3801, %v541_v29   ;;  %v549_v29 = vld [vmem:[%s4573_s2 + $0xe8] sm:$0xff] }
  0x2e   :  { %799 = vperm.xlu1 %3802, %v544_v30   ;;  %v47_v30 = vld [vmem:[%s4573_s2 + $0x70] sm:$0xff] }
  0x2f   :  { %794 = vperm.xlu0 %3801, %v543_v31   ;;  %v1549_v31 = vld [vmem:[%s4573_s2 + $0x1d8] sm:$0xff] }
  0x32   :  { %809 = vperm.xlu1 %3802, %v546_v32   ;;  %v1049_v32 = vld [vmem:[%s4573_s2 + $0x160] sm:$0xff] }
  0x33   :  { %804 = vperm.xlu0 %3801, %v545_v33   ;;  %v2547_v33 = vld [vmem:[%s4573_s2 + $0x2b8] sm:$0xff] }
  0x36   :  { %920 = vperm.xlu1 %3802, %v548_v34   ;;  %v2049_v34 = vld [vmem:[%s4573_s2 + $0x250] sm:$0xff] }
  0x37   :  { %915 = vperm.xlu0 %3801, %v547_v35   ;;  %v2549_v35 = vld [vmem:[%s4573_s2 + $0x2c8] sm:$0xff] }
  0x3a   :  { %1057 = vperm.xlu1 %3802, %v1036_v36   ;;  %v2548_v36 = vld [vmem:[%s4573_s2 + $0x2c0] sm:$0xff] }
  0x3b   :  { %1052 = vperm.xlu0 %3801, %v1035_v37  }
  0x3e   :  { %1067 = vperm.xlu1 %3802, %v1038_v38  }
  0x3f   :  { %1062 = vperm.xlu0 %3801, %v1037_v39  }
  0x42   :  { %1178 = vperm.xlu1 %3802, %v1040_v40  }
  0x43   :  { %1173 = vperm.xlu0 %3801, %v1039_v41  }
  0x46   :  { %1188 = vperm.xlu1 %3802, %v1042_v42  }
  0x47   :  { %1183 = vperm.xlu0 %3801, %v1041_v43  }
  0x4a   :  { %1299 = vperm.xlu1 %3802, %v1044_v44  }
  0x4b   :  { %1294 = vperm.xlu0 %3801, %v1043_v45  }
  0x4e   :  { %1309 = vperm.xlu1 %3802, %v1046_v46  }
  0x4f   :  { %1304 = vperm.xlu0 %3801, %v1045_v47  }
  0x52   :  { %1420 = vperm.xlu1 %3802, %v1048_v48  }
  0x53   :  { %1415 = vperm.xlu0 %3801, %v1047_v49  }
  0x56   :  { %1557 = vperm.xlu1 %3802, %v1536_v50  }
  0x57   :  { %1552 = vperm.xlu0 %3801, %v1535_v51  }
  0x5a   :  { %1567 = vperm.xlu1 %3802, %v1538_v52  }
  0x5b   :  { %1562 = vperm.xlu0 %3801, %v1537_v53  }
  0x5e   :  { %1678 = vperm.xlu1 %3802, %v1540_v54  }
  0x5f   :  { %1673 = vperm.xlu0 %3801, %v1539_v55   ;;  %v23_v55 = vld [vmem:[%s4575_s1 + $0x28] sm:$0xff] }
  0x62   :  { %1688 = vperm.xlu1 %3802, %v1542_v56   ;;  %v24_v56 = vld [vmem:[%s4575_s1 + $0x30] sm:$0xff] }
  0x63   :  { %1683 = vperm.xlu0 %3801, %v1541_v57   ;;  %v25_v57 = vld [vmem:[%s4575_s1 + $0x38] sm:$0xff] }
  0x66   :  { %1799 = vperm.xlu1 %3802, %v1544_v58   ;;  %v26_v58 = vld [vmem:[%s4575_s1 + $0x40] sm:$0xff] }
  0x67   :  { %1794 = vperm.xlu0 %3801, %v1543_v59  }
  0x6a   :  { %1809 = vperm.xlu1 %3802, %v1546_v60  }
  0x6b   :  { %1804 = vperm.xlu0 %3801, %v1545_v61  }
  0x6e   :  { %1920 = vperm.xlu1 %3802, %v1548_v63  }
  0x6f   :  { %1915 = vperm.xlu0 %3801, %v1547_v0  }
  0x72   :  { %2057 = vperm.xlu1 %3802, %v2036_v1  }
  0x73   :  { %2052 = vperm.xlu0 %3801, %v2035_v2  }
  0x76   :  { %2067 = vperm.xlu1 %3802, %v2038_v5  }
  0x77   :  { %2062 = vperm.xlu0 %3801, %v2037_v6  }
  0x7a   :  { %2178 = vperm.xlu1 %3802, %v2040_v7  }
  0x7b   :  { %2173 = vperm.xlu0 %3801, %v2039_v8  }
  0x7e   :  { %2188 = vperm.xlu1 %3802, %v2042_v9  }
  0x7f   :  { %2183 = vperm.xlu0 %3801, %v2041_v10  }
  0x81   :  { %v51_v37 = vpop.permute.xlu0 %50  ;;  %v61_v38 = vpop.permute.xlu1 %60 }
  0x82   :  { %2299 = vperm.xlu1 %3802, %v2044_v11  }
  0x83   :  { %2294 = vperm.xlu0 %3801, %v2043_v12  }
  0x85   :  { %v66_v45 = vpop.permute.xlu1 %65 }
  0x86   :  { %2309 = vperm.xlu1 %3802, %v2046_v13   ;;  %v56_v39 = vpop.permute.xlu0 %55 }
  0x87   :  { %2304 = vperm.xlu0 %3801, %v2045_v14  }
  0x89   :  { %v178_v59 = vpop.permute.xlu1 %177 }
  0x8a   :  { %2420 = vperm.xlu1 %3802, %v2048_v15   ;;  %v173_v60 = vpop.permute.xlu0 %172  ;;  %v27_v15 = vld [vmem:[%s4575_s1 + $0x48] sm:$0xff] }
  0x8b   :  { %2415 = vperm.xlu0 %3801, %v2047_v16   ;;  %v28_v16 = vld [vmem:[%s4575_s1 + $0x50] sm:$0xff] }
  0x8d   :  { %v188_v2 = vpop.permute.xlu1 %187 }
  0x8e   :  { %2557 = vperm.xlu1 %3802, %v2536_v17   ;;  %v183_v7 = vpop.permute.xlu0 %182  ;;  %v29_v17 = vld [vmem:[%s4575_s1 + $0x58] sm:$0xff] }
  0x8f   :  { %2552 = vperm.xlu0 %3801, %v2535_v18   ;;  %v3804_v18 = vmov 0.0|0.0  }
  0x90   :  { %3645 = vmatprep.subr.bf16.mxu1 %v3804_v18 }
  0x92   :  { %2567 = vperm.xlu1 %3802, %v2538_v19   ;;  %v3806_v19 = vmov 0.0  }
  0x93   :  { %2562 = vperm.xlu0 %3801, %v2537_v20   ;;  %3341 = vmatprep.mubr.msk.f32.mxu1 %vm3805_vm2, %v3806_v19  ;;  %v300_v20 = vpop.permute.xlu1 %299 }
  0x96   :  { %2678 = vperm.xlu1 %3802, %v2540_v21   ;;  %v295_v21 = vpop.permute.xlu0 %294 }
  0x97   :  { %2673 = vperm.xlu0 %3801, %v2539_v22  }
  0x9a   :  { %2688 = vperm.xlu1 %3802, %v2542_v23  }
  0x9b   :  { %2683 = vperm.xlu0 %3801, %v2541_v24  }
  0x9e   :  { %2799 = vperm.xlu1 %3802, %v2544_v25  }
  0x9f   :  { %2794 = vperm.xlu0 %3801, %v2543_v26  }
  0xa2   :  { %2809 = vperm.xlu1 %3802, %v2546_v27   ;;  %v310_v27 = vpop.permute.xlu1 %309 }
  0xa3   :  { %2804 = vperm.xlu0 %3801, %v2545_v28  }
  0xa6   :  { %925 = vperm.xlu1 %3802, %v549_v29  }
  0xa7   :  { %425 = vperm.xlu0 %3801, %v47_v30   ;;  %v305_v30 = vpop.permute.xlu0 %304 }
  0xaa   :  { %1925 = vperm.xlu1 %3802, %v1549_v31  }
  0xab   :  { %1425 = vperm.xlu0 %3801, %v1049_v32  }
  0xae   :  { %2915 = vperm.xlu1 %3802, %v2547_v33  }
  0xaf   :  { %2425 = vperm.xlu0 %3801, %v2049_v34  }
  0xb2   :  { %2925 = vperm.xlu1 %3802, %v2549_v35  }
  0xb3   :  { %2920 = vperm.xlu0 %3801, %v2548_v36  }
  0xdc   :  { %v3301_v40 = vpop.f32.mrb[0].mxu0 }
  0xdd   :  { %v153_v41 = vadd.f32 %v3301_v40, %v56_v39  ;;  %v147_v42 = vpop.f32.mrb[1].mxu0  ;;  %v31_v39 = vld [vmem:[%s4575_s1 + $0x68] sm:$0xff]  ;;  %v520_v40 = vld [vmem:[%s4575_s1 + $0x78] sm:$0xff] }
  0xde   :  { %v148_v43 = vadd.f32 %v147_v42, %v51_v37 }
  0xdf   :  { %v167_v44 = vmax.f32 %v153_v41, 0.0 }
  0xe0   :  { %v166_v46 = vmax.f32 %v148_v43, 0.0  ;;  %v3304_v47 = vpop.f32.mrb[2].mxu0  ;;  %v416_v43 = vpop.permute.xlu0 %415 }
  0xe1   :  { %v163_v48 = vadd.f32 %v3304_v47, %v66_v45  ;;  %v157_v49 = vpop.f32.mrb[3].mxu0  ;;  %v421_v45 = vpop.permute.xlu1 %420 }
  0xe2   :  { %v3629_v50 = vpack.c.bf16 %v167_v44, %v166_v46  ;;  %v158_v51 = vadd.f32 %v157_v49, %v61_v38  ;;  %v30_v38 = vld [vmem:[%s4575_s1 + $0x60] sm:$0xff] }
  0xe3   :  { %v169_v52 = vmax.f32 %v163_v48, 0.0 }
  0xe4   :  { %v168_v53 = vmax.f32 %v158_v51, 0.0  ;;  %3630 = vmatprep.subr.bf16.mxu0 %v3629_v50 }
  0xe5   :  { %3632 = vmatpush3.bf16.msra.mxu0 %v3629_v50 }
  0xe6   :  { %v3633_v54 = vpack.c.bf16 %v169_v52, %v168_v53  ;;  %v521_v52 = vld [vmem:[%s4575_s1 + $0x80] sm:$0xff]  ;;  %v522_v53 = vld [vmem:[%s4575_s1 + $0x88] sm:$0xff] }
  0xe8   :  { %3634 = vmatprep.subr.bf16.mxu0 %v3633_v54 }
  0xe9   :  { %3636 = vmatpush3.bf16.msra.mxu0 %v3633_v54  ;;  %v558_v54 = vpop.permute.xlu1 %557 }
  0xec   :  { %3314 = vmatmul.mubr.msk.f32.vlgmr.msra.gmra.mrb[4].mxu0 %vm190_vm1, %v23_v55  ;;  %v553_v55 = vpop.permute.xlu0 %552 }
  0xed   :  { %3316 = vmatprep.mubr.msk.f32.mxu0 %vm190_vm1, %v24_v56 }
  0xf0   :  { %3317 = vmatmul.mubr.msk.f32.gmra.mrb[6].mxu0 %vm190_vm1, %v25_v57 }
  0xf1   :  { %3327 = vmatprep.mubr.msk.f32.mxu0 %vm190_vm1, %v26_v58 }
 0x1bf   :  { %v3315_v61 = vpop.f32.mrb[4].mxu0 }
 0x1c0   :  { %v275_v62 = vadd.f32 %v3315_v61, %v178_v59  ;;  %v269_v63 = vpop.f32.mrb[5].mxu0  ;;  %v568_v61 = vpop.permute.xlu1 %567 }
 0x1c1   :  { %v270_v0 = vadd.f32 %v269_v63, %v173_v60 }
 0x1c2   :  { %v289_v1 = vmax.f32 %v275_v62, 0.0 }
 0x1c3   :  { %v288_v5 = vmax.f32 %v270_v0, 0.0  ;;  %v3318_v6 = vpop.f32.mrb[6].mxu0  ;;  %v563_v0 = vpop.permute.xlu0 %562 }
 0x1c4   :  { %v285_v8 = vadd.f32 %v3318_v6, %v188_v2  ;;  %v279_v9 = vpop.f32.mrb[7].mxu0 }
 0x1c5   :  { %v3637_v10 = vpack.c.bf16 %v289_v1, %v288_v5  ;;  %v280_v11 = vadd.f32 %v279_v9, %v183_v7 }
 0x1c6   :  { %v291_v12 = vmax.f32 %v285_v8, 0.0 }
 0x1c7   :  { %v290_v13 = vmax.f32 %v280_v11, 0.0  ;;  %3638 = vmatprep.subr.bf16.mxu0 %v3637_v10  ;;  %v526_v11 = vld [vmem:[%s4575_s1 + $0xa8] sm:$0xff] }
 0x1c8   :  { %3640 = vmatpush3.bf16.msra.mxu0 %v3637_v10  ;;  %v525_v10 = vld [vmem:[%s4575_s1 + $0xa0] sm:$0xff] }
 0x1c9   :  { %v3641_v14 = vpack.c.bf16 %v291_v12, %v290_v13  ;;  %v527_v12 = vld [vmem:[%s4575_s1 + $0xb0] sm:$0xff] }
 0x1ca   :  { %v32_v13 = vld [vmem:[%s4575_s1 + $0x70] sm:$0xff] }
 0x1cb   :  { %3642 = vmatprep.subr.bf16.mxu0 %v3641_v14 }
 0x1cc   :  { %3644 = vmatpush3.bf16.msra.mxu0 %v3641_v14  ;;  %v528_v14 = vld [vmem:[%s4575_s1 + $0xb8] sm:$0xff] }
 0x1cf   :  { %3328 = vmatmul.mubr.msk.f32.vlgmr.msra.gmra.mrb[8].mxu0 %vm190_vm1, %v27_v15  ;;  %v679_v15 = vpop.permute.xlu1 %678 }
 0x1d0   :  { %3330 = vmatprep.mubr.msk.f32.mxu0 %vm190_vm1, %v28_v16  ;;  %v674_v16 = vpop.permute.xlu0 %673 }
 0x1d3   :  { %3331 = vmatmul.mubr.msk.f32.gmra.mrb[10].mxu0 %vm190_vm1, %v29_v17 }
 0x1d4   :  { %3354 = vmatprep.mubr.msk.f32.mxu0 %vm68_vm0, %v520_v40 }
 0x2a2   :  { %v3329_v22 = vpop.f32.mrb[8].mxu0 }
 0x2a3   :  { %v396_v23 = vadd.f32 %v3329_v22, %v300_v20  ;;  %v390_v24 = vpop.f32.mrb[9].mxu0 }
 0x2a4   :  { %v391_v25 = vadd.f32 %v390_v24, %v295_v21  ;;  %v689_v24 = vpop.permute.xlu1 %688 }
 0x2a5   :  { %v410_v26 = vmax.f32 %v396_v23, 0.0 }
 0x2a6   :  { %v409_v28 = vmax.f32 %v391_v25, 0.0  ;;  %v3332_v29 = vpop.f32.mrb[10].mxu0 }
 0x2a7   :  { %v406_v31 = vadd.f32 %v3332_v29, %v310_v27  ;;  %v400_v32 = vpop.f32.mrb[11].mxu0  ;;  %v684_v27 = vpop.permute.xlu0 %683 }
 0x2a8   :  { %v401_v33 = vadd.f32 %v400_v32, %v305_v30  ;;  %v3646_v34 = vpack.c.bf16 %v410_v26, %v409_v28 }
 0x2a9   :  { %v412_v35 = vmax.f32 %v406_v31, 0.0 }
 0x2aa   :  { %v411_v36 = vmax.f32 %v401_v33, 0.0  ;;  %3647 = vmatpush3.bf16.msra.mxu1 %v3646_v34 }
 0x2ab   :  { %3648 = vmatprep.subr.bf16.mxu1 %v3804_v18 }
 0x2ac   :  { %v3649_v37 = vpack.c.bf16 %v412_v35, %v411_v36  ;;  %v529_v35 = vld [vmem:[%s4575_s1 + $0xc0] sm:$0xff]  ;;  %v530_v36 = vld [vmem:[%s4575_s1 + $0xc8] sm:$0xff] }
 0x2ae   :  { %3650 = vmatpush3.bf16.msra.mxu1 %v3649_v37  ;;  %v531_v37 = vld [vmem:[%s4575_s1 + $0xd0] sm:$0xff] }
 0x2b1   :  { %3342 = vmatmul.mubr.msk.f32.vlgmr.msra.gmra.mrb[0].mxu1 %vm190_vm1, %v30_v38  ;;  %v800_v38 = vpop.permute.xlu1 %799 }
 0x2b2   :  { %3344 = vmatprep.mubr.msk.f32.mxu1 %vm3805_vm2, %v3806_v19 }
 0x2b5   :  { %3345 = vmatmul.mubr.msk.f32.gmra.mrb[2].mxu1 %vm190_vm1, %v31_v39  ;;  %v795_v39 = vpop.permute.xlu0 %794 }
 0x2b6   :  { %3347 = vmatprep.mubr.msk.f32.mxu1 %vm3805_vm2, %v3806_v19 }
 0x2b9   :  { %3348 = vmatmul.mubr.msk.f32.gmra.mrb[4].mxu1 %vm190_vm1, %v32_v13 }
 0x2ba   :  { %3382 = vmatprep.mubr.msk.f32.mxu1 %vm190_vm1, %v528_v14 }
 0x384   :  { %v503_v41 = vpop.f32.mrb[0].mxu1 }
 0x385   :  { %v3343_v42 = vpop.f32.mrb[1].mxu1  ;;  %v504_v44 = vadd.f32 %v503_v41, %v416_v43 }
 0x387   :  { %v4183_v49 = vadd.f32 %v504_v44, %v3841_v3  ;;  %v523_v3 = vld [vmem:[%s4575_s1 + $0x90] sm:$0xff] }
 0x388   :  { %v508_v46 = vpop.f32.mrb[2].mxu1 }
 0x389   :  { %v509_v47 = vadd.f32 %v508_v46, %v421_v45  ;;  %v3346_v48 = vpop.f32.mrb[3].mxu1  ;;  %v810_v45 = vpop.permute.xlu1 %809 }
 0x38a   :  { %v805_v48 = vpop.permute.xlu0 %804 }
 0x38b   :  { %v4186_v50 = vadd.f32 %v509_v47, %v3846_v4  ;;  %v524_v4 = vld [vmem:[%s4575_s1 + $0x98] sm:$0xff] }
 0x38d   :  { %v3651_v51 = vpack.c.bf16 %v4186_v50, %v4183_v49 }
 0x38f   :  { %3652 = vmatprep.subr.bf16.mxu0 %v3651_v51 }
 0x390   :  { %3654 = vmatpush3.bf16.msra.mxu0 %v3651_v51 }
 0x393   :  { %3355 = vmatmul.mubr.msk.f32.vlgmr.msra.gmra.mrb[12].mxu0 %vm68_vm0, %v521_v52 }
 0x394   :  { %3357 = vmatprep.mubr.msk.f32.mxu0 %vm68_vm0, %v522_v53 }
 0x397   :  { %3358 = vmatmul.mubr.msk.f32.gmra.mrb[14].mxu0 %vm68_vm0, %v523_v3 }
 0x398   :  { %3368 = vmatprep.mubr.msk.f32.mxu0 %vm190_vm1, %v524_v4 }
 0x466   :  { %v3356_v56 = vpop.f32.mrb[12].mxu0 }
 0x467   :  { %v654_v57 = vadd.f32 %v3356_v56, %v558_v54  ;;  %v648_v58 = vpop.f32.mrb[13].mxu0  ;;  %v532_v56 = vld [vmem:[%s4575_s1 + $0xd8] sm:$0xff] }
 0x468   :  { %v649_v59 = vadd.f32 %v648_v58, %v553_v55  ;;  %v1020_v58 = vld [vmem:[%s4575_s1 + $0xf0] sm:$0xff] }
 0x469   :  { %v668_v60 = vmax.f32 %v654_v57, 0.0  ;;  %v533_v57 = vld [vmem:[%s4575_s1 + $0xe0] sm:$0xff] }
 0x46a   :  { %v667_v62 = vmax.f32 %v649_v59, 0.0  ;;  %v3359_v63 = vpop.f32.mrb[14].mxu0 }
 0x46b   :  { %v664_v1 = vadd.f32 %v3359_v63, %v568_v61  ;;  %v658_v2 = vpop.f32.mrb[15].mxu0  ;;  %v916_v61 = vpop.permute.xlu0 %915 }
 0x46c   :  { %v3655_v5 = vpack.c.bf16 %v668_v60, %v667_v62  ;;  %v659_v6 = vadd.f32 %v658_v2, %v563_v0  ;;  %v921_v63 = vpop.permute.xlu1 %920 }
 0x46d   :  { %v670_v7 = vmax.f32 %v664_v1, 0.0 }
 0x46e   :  { %v669_v8 = vmax.f32 %v659_v6, 0.0  ;;  %3656 = vmatprep.subr.bf16.mxu0 %v3655_v5 }
 0x46f   :  { %3658 = vmatpush3.bf16.msra.mxu0 %v3655_v5 }
 0x470   :  { %v3659_v9 = vpack.c.bf16 %v670_v7, %v669_v8  ;;  %v1021_v8 = vld [vmem:[%s4575_s1 + $0xf8] sm:$0xff] }
 0x472   :  { %3660 = vmatprep.subr.bf16.mxu0 %v3659_v9 }
 0x473   :  { %3662 = vmatpush3.bf16.msra.mxu0 %v3659_v9  ;;  %v1022_v9 = vld [vmem:[%s4575_s1 + $0x100] sm:$0xff] }
 0x476   :  { %3369 = vmatmul.mubr.msk.f32.vlgmr.msra.gmra.mrb[16].mxu0 %vm190_vm1, %v525_v10  ;;  %v1058_v10 = vpop.permute.xlu1 %1057 }
 0x477   :  { %3371 = vmatprep.mubr.msk.f32.mxu0 %vm190_vm1, %v526_v11  ;;  %v1053_v11 = vpop.permute.xlu0 %1052 }
 0x47a   :  { %3372 = vmatmul.mubr.msk.f32.gmra.mrb[18].mxu0 %vm190_vm1, %v527_v12 }
 0x47b   :  { %3409 = vmatprep.mubr.msk.f32.mxu0 %vm68_vm0, %v1020_v58 }
 0x549   :  { %v3370_v17 = vpop.f32.mrb[16].mxu0 }
 0x54a   :  { %v775_v20 = vadd.f32 %v3370_v17, %v679_v15  ;;  %v769_v21 = vpop.f32.mrb[17].mxu0  ;;  %v1068_v17 = vpop.permute.xlu1 %1067 }
 0x54b   :  { %v770_v22 = vadd.f32 %v769_v21, %v674_v16 }
 0x54c   :  { %v789_v23 = vmax.f32 %v775_v20, 0.0 }
 0x54d   :  { %v788_v25 = vmax.f32 %v770_v22, 0.0  ;;  %v3373_v26 = vpop.f32.mrb[18].mxu0  ;;  %v1063_v22 = vpop.permute.xlu0 %1062 }
 0x54e   :  { %v785_v28 = vadd.f32 %v3373_v26, %v689_v24  ;;  %v779_v29 = vpop.f32.mrb[19].mxu0 }
 0x54f   :  { %v3663_v30 = vpack.c.bf16 %v789_v23, %v788_v25  ;;  %v780_v31 = vadd.f32 %v779_v29, %v684_v27 }
 0x550   :  { %v791_v32 = vmax.f32 %v785_v28, 0.0 }
 0x551   :  { %v790_v33 = vmax.f32 %v780_v31, 0.0  ;;  %3664 = vmatprep.subr.bf16.mxu1 %v3663_v30  ;;  %v1026_v31 = vld [vmem:[%s4575_s1 + $0x120] sm:$0xff] }
 0x552   :  { %3666 = vmatpush3.bf16.msra.mxu1 %v3663_v30  ;;  %v1025_v30 = vld [vmem:[%s4575_s1 + $0x118] sm:$0xff] }
 0x553   :  { %v3667_v34 = vpack.c.bf16 %v791_v32, %v790_v33  ;;  %v1027_v32 = vld [vmem:[%s4575_s1 + $0x128] sm:$0xff] }
 0x554   :  { %v534_v33 = vld [vmem:[%s4575_s1 + $0xe8] sm:$0xff] }
 0x555   :  { %3668 = vmatprep.subr.bf16.mxu1 %v3667_v34 }
 0x556   :  { %3670 = vmatpush3.bf16.msra.mxu1 %v3667_v34  ;;  %v1028_v34 = vld [vmem:[%s4575_s1 + $0x130] sm:$0xff] }
 0x557   :  { %3671 = vmatprep.subr.bf16.mxu1 %v3804_v18 }
 0x559   :  { %3383 = vmatmul.mubr.msk.f32.vlgmr.msra.gmra.mrb[6].mxu1 %vm190_vm1, %v529_v35  ;;  %v1179_v35 = vpop.permute.xlu1 %1178 }
 0x55a   :  { %3385 = vmatprep.mubr.msk.f32.mxu1 %vm190_vm1, %v530_v36  ;;  %v1174_v36 = vpop.permute.xlu0 %1173 }
 0x55d   :  { %3386 = vmatmul.mubr.msk.f32.gmra.mrb[8].mxu1 %vm190_vm1, %v531_v37 }
 0x55e   :  { %3396 = vmatprep.mubr.msk.f32.mxu1 %vm3805_vm2, %v3806_v19 }
 0x62c   :  { %v3384_v40 = vpop.f32.mrb[6].mxu1 }
 0x62d   :  { %v896_v41 = vadd.f32 %v3384_v40, %v800_v38  ;;  %v890_v42 = vpop.f32.mrb[7].mxu1 }
 0x62e   :  { %v891_v43 = vadd.f32 %v890_v42, %v795_v39  ;;  %v1189_v42 = vpop.permute.xlu1 %1188 }
 0x62f   :  { %v910_v44 = vmax.f32 %v896_v41, 0.0 }
 0x630   :  { %v909_v46 = vmax.f32 %v891_v43, 0.0  ;;  %v3387_v47 = vpop.f32.mrb[8].mxu1 }
 0x631   :  { %v906_v51 = vadd.f32 %v3387_v47, %v810_v45  ;;  %v900_v52 = vpop.f32.mrb[9].mxu1  ;;  %v1184_v45 = vpop.permute.xlu0 %1183 }
 0x632   :  { %v3672_v53 = vpack.c.bf16 %v910_v44, %v909_v46  ;;  %v901_v3 = vadd.f32 %v900_v52, %v805_v48 }
 0x633   :  { %v912_v4 = vmax.f32 %v906_v51, 0.0 }
 0x634   :  { %v911_v54 = vmax.f32 %v901_v3, 0.0  ;;  %3673 = vmatpush3.bf16.msra.mxu1 %v3672_v53 }
 0x635   :  { %3674 = vmatprep.subr.bf16.mxu1 %v3804_v18 }
 0x636   :  { %v3675_v55 = vpack.c.bf16 %v912_v4, %v911_v54  ;;  %v1029_v4 = vld [vmem:[%s4575_s1 + $0x138] sm:$0xff]  ;;  %v1030_v54 = vld [vmem:[%s4575_s1 + $0x140] sm:$0xff] }
 0x638   :  { %3676 = vmatpush3.bf16.msra.mxu1 %v3675_v55  ;;  %v1031_v55 = vld [vmem:[%s4575_s1 + $0x148] sm:$0xff] }
 0x63b   :  { %3397 = vmatmul.mubr.msk.f32.vlgmr.msra.gmra.mrb[10].mxu1 %vm190_vm1, %v532_v56  ;;  %v1300_v56 = vpop.permute.xlu1 %1299 }
 0x63c   :  { %3399 = vmatprep.mubr.msk.f32.mxu1 %vm3805_vm2, %v3806_v19 }
 0x63f   :  { %3400 = vmatmul.mubr.msk.f32.gmra.mrb[12].mxu1 %vm190_vm1, %v533_v57  ;;  %v1295_v57 = vpop.permute.xlu0 %1294 }
 0x640   :  { %3402 = vmatprep.mubr.msk.f32.mxu1 %vm3805_vm2, %v3806_v19 }
 0x643   :  { %3403 = vmatmul.mubr.msk.f32.gmra.mrb[4].mxu1 %vm190_vm1, %v534_v33 }
 0x644   :  { %3437 = vmatprep.mubr.msk.f32.mxu1 %vm190_vm1, %v1028_v34 }
 0x70e   :  { %v1003_v59 = vpop.f32.mrb[10].mxu1 }
 0x70f   :  { %v3398_v60 = vpop.f32.mrb[11].mxu1  ;;  %v1004_v62 = vadd.f32 %v1003_v59, %v916_v61 }
 0x711   :  { %v4259_v5 = vadd.f32 %v1004_v62, %v4183_v49  ;;  %v1023_v49 = vld [vmem:[%s4575_s1 + $0x108] sm:$0xff] }
 0x712   :  { %v1008_v0 = vpop.f32.mrb[12].mxu1 }
 0x713   :  { %v1009_v1 = vadd.f32 %v1008_v0, %v921_v63  ;;  %v3401_v2 = vpop.f32.mrb[13].mxu1  ;;  %v1310_v63 = vpop.permute.xlu1 %1309 }
 0x714   :  { %v1305_v2 = vpop.permute.xlu0 %1304 }
 0x715   :  { %v4262_v6 = vadd.f32 %v1009_v1, %v4186_v50  ;;  %v1024_v50 = vld [vmem:[%s4575_s1 + $0x110] sm:$0xff] }
 0x717   :  { %v3677_v7 = vpack.c.bf16 %v4262_v6, %v4259_v5 }
 0x719   :  { %3678 = vmatprep.subr.bf16.mxu0 %v3677_v7 }
 0x71a   :  { %3680 = vmatpush3.bf16.msra.mxu0 %v3677_v7 }
 0x71d   :  { %3410 = vmatmul.mubr.msk.f32.vlgmr.msra.gmra.mrb[20].mxu0 %vm68_vm0, %v1021_v8 }
 0x71e   :  { %3412 = vmatprep.mubr.msk.f32.mxu0 %vm68_vm0, %v1022_v9 }
 0x721   :  { %3413 = vmatmul.mubr.msk.f32.gmra.mrb[22].mxu0 %vm68_vm0, %v1023_v49 }
 0x722   :  { %3423 = vmatprep.mubr.msk.f32.mxu0 %vm190_vm1, %v1024_v50 }
 0x7f0   :  { %v3411_v12 = vpop.f32.mrb[20].mxu0 }
 0x7f1   :  { %v1154_v13 = vadd.f32 %v3411_v12, %v1058_v10  ;;  %v1148_v14 = vpop.f32.mrb[21].mxu0  ;;  %v1032_v12 = vld [vmem:[%s4575_s1 + $0x150] sm:$0xff] }
 0x7f2   :  { %v1149_v15 = vadd.f32 %v1148_v14, %v1053_v11  ;;  %v1520_v14 = vld [vmem:[%s4575_s1 + $0x168] sm:$0xff] }
 0x7f3   :  { %v1168_v16 = vmax.f32 %v1154_v13, 0.0  ;;  %v1033_v13 = vld [vmem:[%s4575_s1 + $0x158] sm:$0xff] }
 0x7f4   :  { %v1167_v20 = vmax.f32 %v1149_v15, 0.0  ;;  %v3414_v21 = vpop.f32.mrb[22].mxu0 }
 0x7f5   :  { %v1164_v23 = vadd.f32 %v3414_v21, %v1068_v17  ;;  %v1158_v24 = vpop.f32.mrb[23].mxu0  ;;  %v1416_v17 = vpop.permute.xlu0 %1415 }
 0x7f6   :  { %v3681_v25 = vpack.c.bf16 %v1168_v16, %v1167_v20  ;;  %v1159_v26 = vadd.f32 %v1158_v24, %v1063_v22  ;;  %v1421_v21 = vpop.permute.xlu1 %1420 }
 0x7f7   :  { %v1170_v27 = vmax.f32 %v1164_v23, 0.0 }
 0x7f8   :  { %v1169_v28 = vmax.f32 %v1159_v26, 0.0  ;;  %3682 = vmatprep.subr.bf16.mxu0 %v3681_v25 }
 0x7f9   :  { %3684 = vmatpush3.bf16.msra.mxu0 %v3681_v25 }
 0x7fa   :  { %v3685_v29 = vpack.c.bf16 %v1170_v27, %v1169_v28  ;;  %v1521_v28 = vld [vmem:[%s4575_s1 + $0x170] sm:$0xff] }
 0x7fc   :  { %3686 = vmatprep.subr.bf16.mxu0 %v3685_v29 }
 0x7fd   :  { %3688 = vmatpush3.bf16.msra.mxu0 %v3685_v29  ;;  %v1522_v29 = vld [vmem:[%s4575_s1 + $0x178] sm:$0xff] }
 0x800   :  { %3424 = vmatmul.mubr.msk.f32.vlgmr.msra.gmra.mrb[24].mxu0 %vm190_vm1, %v1025_v30  ;;  %v1558_v30 = vpop.permute.xlu1 %1557 }
 0x801   :  { %3426 = vmatprep.mubr.msk.f32.mxu0 %vm190_vm1, %v1026_v31  ;;  %v1553_v31 = vpop.permute.xlu0 %1552 }
 0x804   :  { %3427 = vmatmul.mubr.msk.f32.gmra.mrb[26].mxu0 %vm190_vm1, %v1027_v32 }
 0x805   :  { %3464 = vmatprep.mubr.msk.f32.mxu0 %vm68_vm0, %v1520_v14 }
 0x8d3   :  { %v3425_v37 = vpop.f32.mrb[24].mxu0 }
 0x8d4   :  { %v1275_v38 = vadd.f32 %v3425_v37, %v1179_v35  ;;  %v1269_v39 = vpop.f32.mrb[25].mxu0  ;;  %v1568_v37 = vpop.permute.xlu1 %1567 }
 0x8d5   :  { %v1270_v40 = vadd.f32 %v1269_v39, %v1174_v36 }
 0x8d6   :  { %v1289_v41 = vmax.f32 %v1275_v38, 0.0 }
 0x8d7   :  { %v1288_v43 = vmax.f32 %v1270_v40, 0.0  ;;  %v3428_v44 = vpop.f32.mrb[26].mxu0  ;;  %v1563_v40 = vpop.permute.xlu0 %1562 }
 0x8d8   :  { %v1285_v46 = vadd.f32 %v3428_v44, %v1189_v42  ;;  %v1279_v47 = vpop.f32.mrb[27].mxu0 }
 0x8d9   :  { %v3689_v48 = vpack.c.bf16 %v1289_v41, %v1288_v43  ;;  %v1280_v51 = vadd.f32 %v1279_v47, %v1184_v45 }
 0x8da   :  { %v1291_v52 = vmax.f32 %v1285_v46, 0.0 }
 0x8db   :  { %v1290_v53 = vmax.f32 %v1280_v51, 0.0  ;;  %3690 = vmatprep.subr.bf16.mxu1 %v3689_v48  ;;  %v1526_v51 = vld [vmem:[%s4575_s1 + $0x198] sm:$0xff] }
 0x8dc   :  { %3692 = vmatpush3.bf16.msra.mxu1 %v3689_v48  ;;  %v1525_v48 = vld [vmem:[%s4575_s1 + $0x190] sm:$0xff] }
 0x8dd   :  { %v3693_v3 = vpack.c.bf16 %v1291_v52, %v1290_v53  ;;  %v1527_v52 = vld [vmem:[%s4575_s1 + $0x1a0] sm:$0xff]  ;;  %v1528_v53 = vld [vmem:[%s4575_s1 + $0x1a8] sm:$0xff] }
 0x8df   :  { %3694 = vmatprep.subr.bf16.mxu1 %v3693_v3 }
 0x8e0   :  { %3696 = vmatpush3.bf16.msra.mxu1 %v3693_v3  ;;  %v1679_v3 = vpop.permute.xlu1 %1678 }
 0x8e1   :  { %3697 = vmatprep.subr.bf16.mxu1 %v3804_v18 }
 0x8e3   :  { %3438 = vmatmul.mubr.msk.f32.vlgmr.msra.gmra.mrb[14].mxu1 %vm190_vm1, %v1029_v4  ;;  %v1674_v4 = vpop.permute.xlu0 %1673 }
 0x8e4   :  { %3440 = vmatprep.mubr.msk.f32.mxu1 %vm190_vm1, %v1030_v54 }
 0x8e7   :  { %3441 = vmatmul.mubr.msk.f32.gmra.mrb[16].mxu1 %vm190_vm1, %v1031_v55 }
 0x8e8   :  { %3451 = vmatprep.mubr.msk.f32.mxu1 %vm3805_vm2, %v3806_v19 }
 0x9b6   :  { %v3439_v58 = vpop.f32.mrb[14].mxu1 }
 0x9b7   :  { %v1396_v59 = vadd.f32 %v3439_v58, %v1300_v56  ;;  %v1390_v60 = vpop.f32.mrb[15].mxu1 }
 0x9b8   :  { %v1391_v61 = vadd.f32 %v1390_v60, %v1295_v57 }
 0x9b9   :  { %v1410_v62 = vmax.f32 %v1396_v59, 0.0  ;;  %v1689_v59 = vpop.permute.xlu1 %1688 }
 0x9ba   :  { %v1409_v0 = vmax.f32 %v1391_v61, 0.0  ;;  %v3442_v1 = vpop.f32.mrb[16].mxu1 }
 0x9bb   :  { %v1406_v7 = vadd.f32 %v3442_v1, %v1310_v63  ;;  %v1400_v8 = vpop.f32.mrb[17].mxu1 }
 0x9bc   :  { %v3698_v9 = vpack.c.bf16 %v1410_v62, %v1409_v0  ;;  %v1401_v49 = vadd.f32 %v1400_v8, %v1305_v2  ;;  %v1684_v62 = vpop.permute.xlu0 %1683 }
 0x9bd   :  { %v1412_v50 = vmax.f32 %v1406_v7, 0.0 }
 0x9be   :  { %v1411_v10 = vmax.f32 %v1401_v49, 0.0  ;;  %3699 = vmatpush3.bf16.msra.mxu1 %v3698_v9  ;;  %v1529_v49 = vld [vmem:[%s4575_s1 + $0x1b0] sm:$0xff] }
 0x9bf   :  { %3700 = vmatprep.subr.bf16.mxu1 %v3804_v18 }
 0x9c0   :  { %v3701_v11 = vpack.c.bf16 %v1412_v50, %v1411_v10  ;;  %v1530_v50 = vld [vmem:[%s4575_s1 + $0x1b8] sm:$0xff]  ;;  %v1531_v10 = vld [vmem:[%s4575_s1 + $0x1c0] sm:$0xff] }
 0x9c2   :  { %3702 = vmatpush3.bf16.msra.mxu1 %v3701_v11  ;;  %v1034_v11 = vld [vmem:[%s4575_s1 + $0x160] sm:$0xff] }
 0x9c3   :  { %3723 = vmatprep.subr.bf16.mxu1 %v3804_v18 }
 0x9c5   :  { %3452 = vmatmul.mubr.msk.f32.vlgmr.msra.gmra.mrb[18].mxu1 %vm190_vm1, %v1032_v12  ;;  %v1800_v12 = vpop.permute.xlu1 %1799 }
 0x9c6   :  { %3454 = vmatprep.mubr.msk.f32.mxu1 %vm3805_vm2, %v3806_v19 }
 0x9c9   :  { %3455 = vmatmul.mubr.msk.f32.gmra.mrb[20].mxu1 %vm190_vm1, %v1033_v13  ;;  %v1795_v13 = vpop.permute.xlu0 %1794 }
 0x9ca   :  { %3457 = vmatprep.mubr.msk.f32.mxu1 %vm3805_vm2, %v3806_v19 }
 0x9cd   :  { %3458 = vmatmul.mubr.msk.f32.gmra.mrb[4].mxu1 %vm190_vm1, %v1034_v11 }
 0x9ce   :  { %3506 = vmatprep.mubr.msk.f32.mxu1 %vm3805_vm2, %v3806_v19 }
 0xa98   :  { %v1503_v15 = vpop.f32.mrb[18].mxu1 }
 0xa99   :  { %v3453_v16 = vpop.f32.mrb[19].mxu1  ;;  %v1504_v20 = vadd.f32 %v1503_v15, %v1416_v17 }
 0xa9b   :  { %v4336_v25 = vadd.f32 %v1504_v20, %v4259_v5  ;;  %v1523_v5 = vld [vmem:[%s4575_s1 + $0x180] sm:$0xff] }
 0xa9c   :  { %v1508_v22 = vpop.f32.mrb[20].mxu1 }
 0xa9d   :  { %v1509_v23 = vadd.f32 %v1508_v22, %v1421_v21  ;;  %v3456_v24 = vpop.f32.mrb[21].mxu1  ;;  %v1810_v21 = vpop.permute.xlu1 %1809 }
 0xa9e   :  { %v1805_v24 = vpop.permute.xlu0 %1804 }
 0xa9f   :  { %v4339_v26 = vadd.f32 %v1509_v23, %v4262_v6  ;;  %v1524_v6 = vld [vmem:[%s4575_s1 + $0x188] sm:$0xff] }
 0xaa1   :  { %v3703_v27 = vpack.c.bf16 %v4339_v26, %v4336_v25 }
 0xaa3   :  { %3704 = vmatprep.subr.bf16.mxu0 %v3703_v27 }
 0xaa4   :  { %3706 = vmatpush3.bf16.msra.mxu0 %v3703_v27 }
 0xaa7   :  { %3465 = vmatmul.mubr.msk.f32.vlgmr.msra.gmra.mrb[28].mxu0 %vm68_vm0, %v1521_v28 }
 0xaa8   :  { %3467 = vmatprep.mubr.msk.f32.mxu0 %vm68_vm0, %v1522_v29 }
 0xaab   :  { %3468 = vmatmul.mubr.msk.f32.gmra.mrb[30].mxu0 %vm68_vm0, %v1523_v5 }
 0xaac   :  { %3478 = vmatprep.mubr.msk.f32.mxu0 %vm190_vm1, %v1524_v6 }
 0xb7a   :  { %v3466_v32 = vpop.f32.mrb[28].mxu0 }
 0xb7b   :  { %v1654_v33 = vadd.f32 %v3466_v32, %v1558_v30  ;;  %v1648_v34 = vpop.f32.mrb[29].mxu0  ;;  %v1532_v32 = vld [vmem:[%s4575_s1 + $0x1c8] sm:$0xff] }
 0xb7c   :  { %v1649_v35 = vadd.f32 %v1648_v34, %v1553_v31  ;;  %v2020_v34 = vld [vmem:[%s4575_s1 + $0x1e0] sm:$0xff] }
 0xb7d   :  { %v1668_v36 = vmax.f32 %v1654_v33, 0.0  ;;  %v1533_v33 = vld [vmem:[%s4575_s1 + $0x1d0] sm:$0xff] }
 0xb7e   :  { %v1667_v38 = vmax.f32 %v1649_v35, 0.0  ;;  %v3469_v39 = vpop.f32.mrb[30].mxu0 }
 0xb7f   :  { %v1664_v41 = vadd.f32 %v3469_v39, %v1568_v37  ;;  %v1658_v42 = vpop.f32.mrb[31].mxu0  ;;  %v1916_v37 = vpop.permute.xlu0 %1915 }
 0xb80   :  { %v3707_v43 = vpack.c.bf16 %v1668_v36, %v1667_v38  ;;  %v1659_v44 = vadd.f32 %v1658_v42, %v1563_v40  ;;  %v1921_v39 = vpop.permute.xlu1 %1920 }
 0xb81   :  { %v1670_v45 = vmax.f32 %v1664_v41, 0.0 }
 0xb82   :  { %v1669_v46 = vmax.f32 %v1659_v44, 0.0  ;;  %3708 = vmatprep.subr.bf16.mxu0 %v3707_v43 }
 0xb83   :  { %3710 = vmatpush3.bf16.msra.mxu0 %v3707_v43 }
 0xb84   :  { %v3711_v47 = vpack.c.bf16 %v1670_v45, %v1669_v46  ;;  %v2021_v46 = vld [vmem:[%s4575_s1 + $0x1e8] sm:$0xff] }
 0xb86   :  { %3712 = vmatprep.subr.bf16.mxu0 %v3711_v47 }
 0xb87   :  { %3714 = vmatpush3.bf16.msra.mxu0 %v3711_v47  ;;  %v2022_v47 = vld [vmem:[%s4575_s1 + $0x1f0] sm:$0xff] }
 0xb8a   :  { %3479 = vmatmul.mubr.msk.f32.vlgmr.msra.gmra.mrb[32].mxu0 %vm190_vm1, %v1525_v48  ;;  %v2024_v48 = vld [vmem:[%s4575_s1 + $0x200] sm:$0xff] }
 0xb8b   :  { %3481 = vmatprep.mubr.msk.f32.mxu0 %vm190_vm1, %v1526_v51  ;;  %v2058_v51 = vpop.permute.xlu1 %2057 }
 0xb8e   :  { %3482 = vmatmul.mubr.msk.f32.gmra.mrb[34].mxu0 %vm190_vm1, %v1527_v52  ;;  %v2053_v52 = vpop.permute.xlu0 %2052 }
 0xb8f   :  { %3492 = vmatprep.mubr.msk.f32.mxu0 %vm190_vm1, %v1528_v53 }
 0xc5d   :  { %v3480_v54 = vpop.f32.mrb[32].mxu0 }
 0xc5e   :  { %v1775_v55 = vadd.f32 %v3480_v54, %v1679_v3  ;;  %v1769_v56 = vpop.f32.mrb[33].mxu0 }
 0xc5f   :  { %v1770_v57 = vadd.f32 %v1769_v56, %v1674_v4  ;;  %v2068_v56 = vpop.permute.xlu1 %2067 }
 0xc60   :  { %v1789_v58 = vmax.f32 %v1775_v55, 0.0 }
 0xc61   :  { %v1788_v60 = vmax.f32 %v1770_v57, 0.0  ;;  %v3483_v61 = vpop.f32.mrb[34].mxu0 }
 0xc62   :  { %v1785_v63 = vadd.f32 %v3483_v61, %v1689_v59  ;;  %v1779_v0 = vpop.f32.mrb[35].mxu0  ;;  %v2063_v59 = vpop.permute.xlu0 %2062 }
 0xc63   :  { %v3715_v1 = vpack.c.bf16 %v1789_v58, %v1788_v60  ;;  %v1780_v2 = vadd.f32 %v1779_v0, %v1684_v62 }
 0xc64   :  { %v1791_v7 = vmax.f32 %v1785_v63, 0.0 }
 0xc65   :  { %v1790_v8 = vmax.f32 %v1780_v2, 0.0  ;;  %3716 = vmatprep.subr.bf16.mxu0 %v3715_v1 }
 0xc66   :  { %3718 = vmatpush3.bf16.msra.mxu0 %v3715_v1 }
 0xc67   :  { %v3719_v9 = vpack.c.bf16 %v1791_v7, %v1790_v8  ;;  %v2025_v7 = vld [vmem:[%s4575_s1 + $0x208] sm:$0xff]  ;;  %v2026_v8 = vld [vmem:[%s4575_s1 + $0x210] sm:$0xff] }
 0xc69   :  { %3720 = vmatprep.subr.bf16.mxu0 %v3719_v9 }
 0xc6a   :  { %3722 = vmatpush3.bf16.msra.mxu0 %v3719_v9  ;;  %v2027_v9 = vld [vmem:[%s4575_s1 + $0x218] sm:$0xff] }
 0xc6d   :  { %3493 = vmatmul.mubr.msk.f32.vlgmr.msra.gmra.mrb[36].mxu0 %vm190_vm1, %v1529_v49  ;;  %v2028_v49 = vld [vmem:[%s4575_s1 + $0x220] sm:$0xff] }
 0xc6e   :  { %3495 = vmatprep.mubr.msk.f32.mxu0 %vm190_vm1, %v1530_v50  ;;  %v2179_v50 = vpop.permute.xlu1 %2178 }
 0xc71   :  { %3496 = vmatmul.mubr.msk.f32.gmra.mrb[38].mxu0 %vm190_vm1, %v1531_v10  ;;  %v2174_v10 = vpop.permute.xlu0 %2173 }
 0xc72   :  { %3519 = vmatprep.mubr.msk.f32.mxu0 %vm68_vm0, %v2020_v34 }
 0xd40   :  { %v3494_v14 = vpop.f32.mrb[36].mxu0 }
 0xd41   :  { %v1896_v15 = vadd.f32 %v3494_v14, %v1800_v12  ;;  %v1890_v16 = vpop.f32.mrb[37].mxu0 }
 0xd42   :  { %v1891_v17 = vadd.f32 %v1890_v16, %v1795_v13  ;;  %v2189_v16 = vpop.permute.xlu1 %2188 }
 0xd43   :  { %v1910_v20 = vmax.f32 %v1896_v15, 0.0 }
 0xd44   :  { %v1909_v22 = vmax.f32 %v1891_v17, 0.0  ;;  %v3497_v23 = vpop.f32.mrb[38].mxu0 }
 0xd45   :  { %v1906_v27 = vadd.f32 %v3497_v23, %v1810_v21  ;;  %v1900_v28 = vpop.f32.mrb[39].mxu0  ;;  %v2184_v21 = vpop.permute.xlu0 %2183 }
 0xd46   :  { %v3724_v29 = vpack.c.bf16 %v1910_v20, %v1909_v22  ;;  %v1901_v5 = vadd.f32 %v1900_v28, %v1805_v24 }
 0xd47   :  { %v1912_v6 = vmax.f32 %v1906_v27, 0.0 }
 0xd48   :  { %v1911_v30 = vmax.f32 %v1901_v5, 0.0  ;;  %3725 = vmatpush3.bf16.msra.mxu1 %v3724_v29 }
 0xd49   :  { %3726 = vmatprep.subr.bf16.mxu1 %v3804_v18 }
 0xd4a   :  { %v3727_v31 = vpack.c.bf16 %v1912_v6, %v1911_v30  ;;  %v2029_v6 = vld [vmem:[%s4575_s1 + $0x228] sm:$0xff]  ;;  %v2030_v30 = vld [vmem:[%s4575_s1 + $0x230] sm:$0xff] }
 0xd4c   :  { %3728 = vmatpush3.bf16.msra.mxu1 %v3727_v31  ;;  %v2031_v31 = vld [vmem:[%s4575_s1 + $0x238] sm:$0xff] }
 0xd4f   :  { %3507 = vmatmul.mubr.msk.f32.vlgmr.msra.gmra.mrb[22].mxu1 %vm190_vm1, %v1532_v32  ;;  %v2300_v32 = vpop.permute.xlu1 %2299 }
 0xd50   :  { %3509 = vmatprep.mubr.msk.f32.mxu1 %vm3805_vm2, %v3806_v19 }
 0xd53   :  { %3510 = vmatmul.mubr.msk.f32.gmra.mrb[24].mxu1 %vm190_vm1, %v1533_v33  ;;  %v2295_v33 = vpop.permute.xlu0 %2294 }
 0xd54   :  { %3512 = vmatprep.mubr.msk.f32.mxu1 %vm3805_vm2, %v3806_v19 }
 0xe22   :  { %v2003_v35 = vpop.f32.mrb[22].mxu1 }
 0xe23   :  { %v3508_v36 = vpop.f32.mrb[23].mxu1  ;;  %v2004_v38 = vadd.f32 %v2003_v35, %v1916_v37 }
 0xe25   :  { %v4411_v43 = vadd.f32 %v2004_v38, %v4336_v25  ;;  %v2023_v25 = vld [vmem:[%s4575_s1 + $0x1f8] sm:$0xff] }
 0xe26   :  { %v2008_v40 = vpop.f32.mrb[24].mxu1 }
 0xe27   :  { %v2009_v41 = vadd.f32 %v2008_v40, %v1921_v39  ;;  %v3511_v42 = vpop.f32.mrb[25].mxu1  ;;  %v2310_v39 = vpop.permute.xlu1 %2309 }
 0xe28   :  { %v2305_v42 = vpop.permute.xlu0 %2304 }
 0xe29   :  { %v4414_v44 = vadd.f32 %v2009_v41, %v4339_v26  ;;  %v1534_v26 = vld [vmem:[%s4575_s1 + $0x1d8] sm:$0xff] }
 0xe2a   :  { %3513 = vmatmul.mubr.msk.f32.gmra.mrb[4].mxu1 %vm190_vm1, %v1534_v26 }
 0xe2b   :  { %v3729_v45 = vpack.c.bf16 %v4414_v44, %v4411_v43  ;;  %3533 = vmatprep.mubr.msk.f32.mxu1 %vm190_vm1, %v2024_v48 }
 0xe2d   :  { %3730 = vmatprep.subr.bf16.mxu0 %v3729_v45 }
 0xe2e   :  { %3732 = vmatpush3.bf16.msra.mxu0 %v3729_v45 }
 0xe31   :  { %3520 = vmatmul.mubr.msk.f32.vlgmr.msra.gmra.mrb[40].mxu0 %vm68_vm0, %v2021_v46 }
 0xe32   :  { %3522 = vmatprep.mubr.msk.f32.mxu0 %vm68_vm0, %v2022_v47 }
 0xe35   :  { %3523 = vmatmul.mubr.msk.f32.gmra.mrb[42].mxu0 %vm68_vm0, %v2023_v25 }
 0xe36   :  { %3547 = vmatprep.mubr.msk.f32.mxu0 %vm190_vm1, %v2028_v49 }
 0xf04   :  { %v3521_v53 = vpop.f32.mrb[40].mxu0 }
 0xf05   :  { %v2154_v3 = vadd.f32 %v3521_v53, %v2058_v51  ;;  %v2148_v4 = vpop.f32.mrb[41].mxu0  ;;  %v2033_v53 = vld [vmem:[%s4575_s1 + $0x248] sm:$0xff] }
 0xf06   :  { %v2149_v54 = vadd.f32 %v2148_v4, %v2053_v52  ;;  %v2032_v52 = vld [vmem:[%s4575_s1 + $0x240] sm:$0xff] }
 0xf07   :  { %v2168_v55 = vmax.f32 %v2154_v3, 0.0  ;;  %v2520_v3 = vld [vmem:[%s4575_s1 + $0x258] sm:$0xff] }
 0xf08   :  { %v2167_v57 = vmax.f32 %v2149_v54, 0.0  ;;  %v3524_v58 = vpop.f32.mrb[42].mxu0 }
 0xf09   :  { %v2164_v60 = vadd.f32 %v3524_v58, %v2068_v56  ;;  %v2158_v61 = vpop.f32.mrb[43].mxu0 }
 0xf0a   :  { %v3733_v62 = vpack.c.bf16 %v2168_v55, %v2167_v57  ;;  %v2159_v63 = vadd.f32 %v2158_v61, %v2063_v59  ;;  %v2416_v55 = vpop.permute.xlu0 %2415  ;;  %v2421_v57 = vpop.permute.xlu1 %2420 }
 0xf0b   :  { %v2170_v0 = vmax.f32 %v2164_v60, 0.0 }
 0xf0c   :  { %v2169_v1 = vmax.f32 %v2159_v63, 0.0  ;;  %3734 = vmatprep.subr.bf16.mxu1 %v3733_v62 }
 0xf0d   :  { %3736 = vmatpush3.bf16.msra.mxu1 %v3733_v62 }
 0xf0e   :  { %v3737_v2 = vpack.c.bf16 %v2170_v0, %v2169_v1  ;;  %v2521_v0 = vld [vmem:[%s4575_s1 + $0x260] sm:$0xff]  ;;  %v2522_v1 = vld [vmem:[%s4575_s1 + $0x268] sm:$0xff] }
 0xf10   :  { %3738 = vmatprep.subr.bf16.mxu1 %v3737_v2 }
 0xf11   :  { %3740 = vmatpush3.bf16.msra.mxu1 %v3737_v2  ;;  %v2558_v2 = vpop.permute.xlu1 %2557 }
 0xf12   :  { %3749 = vmatprep.subr.bf16.mxu1 %v3804_v18 }
 0xf14   :  { %3534 = vmatmul.mubr.msk.f32.vlgmr.msra.gmra.mrb[26].mxu1 %vm190_vm1, %v2025_v7  ;;  %v2553_v7 = vpop.permute.xlu0 %2552 }
 0xf15   :  { %3536 = vmatprep.mubr.msk.f32.mxu1 %vm190_vm1, %v2026_v8 }
 0xf18   :  { %3537 = vmatmul.mubr.msk.f32.gmra.mrb[28].mxu1 %vm190_vm1, %v2027_v9 }
 0xf19   :  { %3561 = vmatprep.mubr.msk.f32.mxu1 %vm3805_vm2, %v3806_v19 }
 0xfe7   :  { %v3535_v11 = vpop.f32.mrb[26].mxu1 }
 0xfe8   :  { %v2275_v12 = vadd.f32 %v3535_v11, %v2179_v50  ;;  %v2269_v13 = vpop.f32.mrb[27].mxu1  ;;  %v2568_v11 = vpop.permute.xlu1 %2567 }
 0xfe9   :  { %v2270_v14 = vadd.f32 %v2269_v13, %v2174_v10 }
 0xfea   :  { %v2289_v15 = vmax.f32 %v2275_v12, 0.0 }
 0xfeb   :  { %v2288_v17 = vmax.f32 %v2270_v14, 0.0  ;;  %v3538_v20 = vpop.f32.mrb[28].mxu1  ;;  %v2563_v14 = vpop.permute.xlu0 %2562 }
 0xfec   :  { %v2285_v22 = vadd.f32 %v3538_v20, %v2189_v16  ;;  %v2279_v23 = vpop.f32.mrb[29].mxu1 }
 0xfed   :  { %v3741_v24 = vpack.c.bf16 %v2289_v15, %v2288_v17  ;;  %v2280_v27 = vadd.f32 %v2279_v23, %v2184_v21 }
 0xfee   :  { %v2291_v28 = vmax.f32 %v2285_v22, 0.0 }
 0xfef   :  { %v2290_v29 = vmax.f32 %v2280_v27, 0.0  ;;  %3742 = vmatprep.subr.bf16.mxu0 %v3741_v24  ;;  %v2526_v27 = vld [vmem:[%s4575_s1 + $0x288] sm:$0xff] }
 0xff0   :  { %3744 = vmatpush3.bf16.msra.mxu0 %v3741_v24  ;;  %v2525_v24 = vld [vmem:[%s4575_s1 + $0x280] sm:$0xff] }
 0xff1   :  { %v3745_v5 = vpack.c.bf16 %v2291_v28, %v2290_v29  ;;  %v2527_v28 = vld [vmem:[%s4575_s1 + $0x290] sm:$0xff] }
 0xff2   :  { %v2034_v29 = vld [vmem:[%s4575_s1 + $0x250] sm:$0xff] }
 0xff3   :  { %3746 = vmatprep.subr.bf16.mxu0 %v3745_v5 }
 0xff4   :  { %3748 = vmatpush3.bf16.msra.mxu0 %v3745_v5  ;;  %v2528_v5 = vld [vmem:[%s4575_s1 + $0x298] sm:$0xff] }
 0xff7   :  { %3548 = vmatmul.mubr.msk.f32.vlgmr.msra.gmra.mrb[44].mxu0 %vm190_vm1, %v2029_v6  ;;  %v2679_v6 = vpop.permute.xlu1 %2678 }
 0xff8   :  { %3550 = vmatprep.mubr.msk.f32.mxu0 %vm190_vm1, %v2030_v30  ;;  %v2674_v30 = vpop.permute.xlu0 %2673 }
 0xffb   :  { %3551 = vmatmul.mubr.msk.f32.gmra.mrb[46].mxu0 %vm190_vm1, %v2031_v31 }
 0xffc   :  { %3574 = vmatprep.mubr.msk.f32.mxu0 %vm68_vm0, %v2520_v3 }
0x10ca   :  { %v3549_v34 = vpop.f32.mrb[44].mxu0 }
0x10cb   :  { %v2396_v35 = vadd.f32 %v3549_v34, %v2300_v32  ;;  %v2390_v36 = vpop.f32.mrb[45].mxu0 }
0x10cc   :  { %v2391_v37 = vadd.f32 %v2390_v36, %v2295_v33  ;;  %v2689_v36 = vpop.permute.xlu1 %2688 }
0x10cd   :  { %v2410_v38 = vmax.f32 %v2396_v35, 0.0 }
0x10ce   :  { %v2409_v40 = vmax.f32 %v2391_v37, 0.0  ;;  %v3552_v41 = vpop.f32.mrb[46].mxu0 }
0x10cf   :  { %v2406_v45 = vadd.f32 %v3552_v41, %v2310_v39  ;;  %v2400_v46 = vpop.f32.mrb[47].mxu0  ;;  %v2684_v39 = vpop.permute.xlu0 %2683 }
0x10d0   :  { %v3750_v47 = vpack.c.bf16 %v2410_v38, %v2409_v40  ;;  %v2401_v25 = vadd.f32 %v2400_v46, %v2305_v42 }
0x10d1   :  { %v2412_v26 = vmax.f32 %v2406_v45, 0.0 }
0x10d2   :  { %v2411_v48 = vmax.f32 %v2401_v25, 0.0  ;;  %3751 = vmatpush3.bf16.msra.mxu1 %v3750_v47 }
0x10d3   :  { %3752 = vmatprep.subr.bf16.mxu1 %v3804_v18 }
0x10d4   :  { %v3753_v51 = vpack.c.bf16 %v2412_v26, %v2411_v48  ;;  %v2529_v26 = vld [vmem:[%s4575_s1 + $0x2a0] sm:$0xff]  ;;  %v2530_v48 = vld [vmem:[%s4575_s1 + $0x2a8] sm:$0xff] }
0x10d6   :  { %3754 = vmatpush3.bf16.msra.mxu1 %v3753_v51  ;;  %v2531_v51 = vld [vmem:[%s4575_s1 + $0x2b0] sm:$0xff] }
0x10d9   :  { %3562 = vmatmul.mubr.msk.f32.vlgmr.msra.gmra.mrb[30].mxu1 %vm190_vm1, %v2032_v52  ;;  %v2800_v52 = vpop.permute.xlu1 %2799 }
0x10da   :  { %3564 = vmatprep.mubr.msk.f32.mxu1 %vm3805_vm2, %v3806_v19 }
0x10dd   :  { %3565 = vmatmul.mubr.msk.f32.gmra.mrb[32].mxu1 %vm190_vm1, %v2033_v53  ;;  %v2795_v53 = vpop.permute.xlu0 %2794 }
0x10de   :  { %3567 = vmatprep.mubr.msk.f32.mxu1 %vm3805_vm2, %v3806_v19 }
0x10e1   :  { %3568 = vmatmul.mubr.msk.f32.gmra.mrb[4].mxu1 %vm190_vm1, %v2034_v29 }
0x10e2   :  { %3602 = vmatprep.mubr.msk.f32.mxu1 %vm190_vm1, %v2528_v5 }
0x11ac   :  { %v2503_v4 = vpop.f32.mrb[30].mxu1 }
0x11ad   :  { %v3563_v54 = vpop.f32.mrb[31].mxu1  ;;  %v2504_v56 = vadd.f32 %v2503_v4, %v2416_v55 }
0x11af   :  { %v4487_v61 = vadd.f32 %v2504_v56, %v4411_v43  ;;  %v2523_v43 = vld [vmem:[%s4575_s1 + $0x270] sm:$0xff] }
0x11b0   :  { %v2508_v58 = vpop.f32.mrb[32].mxu1 }
0x11b1   :  { %v2509_v59 = vadd.f32 %v2508_v58, %v2421_v57  ;;  %v3566_v60 = vpop.f32.mrb[33].mxu1  ;;  %v2810_v57 = vpop.permute.xlu1 %2809 }
0x11b2   :  { %v2805_v60 = vpop.permute.xlu0 %2804 }
0x11b3   :  { %v4490_v62 = vadd.f32 %v2509_v59, %v4414_v44  ;;  %v2524_v44 = vld [vmem:[%s4575_s1 + $0x278] sm:$0xff] }
0x11b5   :  { %v3755_v63 = vpack.c.bf16 %v4490_v62, %v4487_v61 }
0x11b7   :  { %3756 = vmatprep.subr.bf16.mxu0 %v3755_v63 }
0x11b8   :  { %3758 = vmatpush3.bf16.msra.mxu0 %v3755_v63 }
0x11bb   :  { %3575 = vmatmul.mubr.msk.f32.vlgmr.msra.gmra.mrb[48].mxu0 %vm68_vm0, %v2521_v0 }
0x11bc   :  { %3577 = vmatprep.mubr.msk.f32.mxu0 %vm68_vm0, %v2522_v1 }
0x11bf   :  { %3578 = vmatmul.mubr.msk.f32.gmra.mrb[50].mxu0 %vm68_vm0, %v2523_v43 }
0x11c0   :  { %3588 = vmatprep.mubr.msk.f32.mxu0 %vm190_vm1, %v2524_v44 }
0x128e   :  { %v3576_v8 = vpop.f32.mrb[48].mxu0 }
0x128f   :  { %v2654_v9 = vadd.f32 %v3576_v8, %v2558_v2  ;;  %v2648_v49 = vpop.f32.mrb[49].mxu0  ;;  %v2532_v8 = vld [vmem:[%s4575_s1 + $0x2b8] sm:$0xff] }
0x1290   :  { %v2649_v50 = vadd.f32 %v2648_v49, %v2553_v7  ;;  %v926_v49 = vpop.permute.xlu1 %925 }
0x1291   :  { %v2668_v10 = vmax.f32 %v2654_v9, 0.0  ;;  %v2533_v9 = vld [vmem:[%s4575_s1 + $0x2c0] sm:$0xff] }
0x1292   :  { %v2667_v12 = vmax.f32 %v2649_v50, 0.0  ;;  %v3579_v13 = vpop.f32.mrb[50].mxu0  ;;  %v426_v50 = vpop.permute.xlu0 %425 }
0x1293   :  { %v2664_v15 = vadd.f32 %v3579_v13, %v2568_v11  ;;  %v2658_v16 = vpop.f32.mrb[51].mxu0 }
0x1294   :  { %v3759_v17 = vpack.c.bf16 %v2668_v10, %v2667_v12  ;;  %v2659_v20 = vadd.f32 %v2658_v16, %v2563_v14  ;;  %v1926_v10 = vpop.permute.xlu1 %1925  ;;  %v3781_v12 = vadd.f32 %v926_v49, %v426_v50 }
0x1295   :  { %v2670_v21 = vmax.f32 %v2664_v15, 0.0 }
0x1296   :  { %v2669_v22 = vmax.f32 %v2659_v20, 0.0  ;;  %3760 = vmatprep.subr.bf16.mxu0 %v3759_v17  ;;  %v1426_v11 = vpop.permute.xlu0 %1425 }
0x1297   :  { %3762 = vmatpush3.bf16.msra.mxu0 %v3759_v17  ;;  %v3782_v13 = vadd.f32 %v3781_v12, %v1426_v11 }
0x1298   :  { %v3763_v23 = vpack.c.bf16 %v2670_v21, %v2669_v22  ;;  %v2916_v14 = vpop.permute.xlu1 %2915 }
0x1299   :  { %v3783_v17 = vadd.f32 %v3782_v13, %v1926_v10 }
0x129a   :  { %3764 = vmatprep.subr.bf16.mxu0 %v3763_v23  ;;  %v2426_v15 = vpop.permute.xlu0 %2425 }
0x129b   :  { %3766 = vmatpush3.bf16.msra.mxu0 %v3763_v23 }
0x129c   :  { %v2926_v22 = vpop.permute.xlu1 %2925 }
0x129e   :  { %3589 = vmatmul.mubr.msk.f32.vlgmr.msra.gmra.mrb[52].mxu0 %vm190_vm1, %v2525_v24  ;;  %v2921_v23 = vpop.permute.xlu0 %2920 }
0x129f   :  { %3591 = vmatprep.mubr.msk.f32.mxu0 %vm190_vm1, %v2526_v27  ;;  %v3784_v27 = vadd.f32 %v3783_v17, %v2426_v15 }
0x12a1   :  { %v3785_v5 = vadd.f32 %v3784_v27, %v2926_v22 }
0x12a2   :  { %3592 = vmatmul.mubr.msk.f32.gmra.mrb[54].mxu0 %vm190_vm1, %v2527_v28 }
0x1371   :  { %v3590_v31 = vpop.f32.mrb[52].mxu0 }
0x1372   :  { %v2775_v32 = vadd.f32 %v3590_v31, %v2679_v6  ;;  %v2769_v33 = vpop.f32.mrb[53].mxu0 }
0x1373   :  { %v2770_v34 = vadd.f32 %v2769_v33, %v2674_v30 }
0x1374   :  { %v2789_v35 = vmax.f32 %v2775_v32, 0.0 }
0x1375   :  { %v2788_v37 = vmax.f32 %v2770_v34, 0.0  ;;  %v3593_v38 = vpop.f32.mrb[54].mxu0 }
0x1376   :  { %v2785_v40 = vadd.f32 %v3593_v38, %v2689_v36  ;;  %v2779_v41 = vpop.f32.mrb[55].mxu0 }
0x1377   :  { %v3767_v42 = vpack.c.bf16 %v2789_v35, %v2788_v37  ;;  %v2780_v45 = vadd.f32 %v2779_v41, %v2684_v39 }
0x1378   :  { %v2791_v46 = vmax.f32 %v2785_v40, 0.0 }
0x1379   :  { %v2790_v47 = vmax.f32 %v2780_v45, 0.0  ;;  %3768 = vmatprep.subr.bf16.mxu1 %v3767_v42 }
0x137a   :  { %3770 = vmatpush3.bf16.msra.mxu1 %v3767_v42 }
0x137b   :  { %v3771_v25 = vpack.c.bf16 %v2791_v46, %v2790_v47 }
0x137d   :  { %3772 = vmatprep.subr.bf16.mxu1 %v3771_v25 }
0x137e   :  { %3774 = vmatpush3.bf16.msra.mxu1 %v3771_v25 }
0x137f   :  { %3775 = vmatprep.subr.bf16.mxu1 %v3804_v18 }
0x1381   :  { %3603 = vmatmul.mubr.msk.f32.vlgmr.msra.gmra.mrb[34].mxu1 %vm190_vm1, %v2529_v26 }
0x1382   :  { %3605 = vmatprep.mubr.msk.f32.mxu1 %vm190_vm1, %v2530_v48 }
0x1385   :  { %3606 = vmatmul.mubr.msk.f32.gmra.mrb[36].mxu1 %vm190_vm1, %v2531_v51 }
0x1386   :  { %3616 = vmatprep.mubr.msk.f32.mxu1 %vm3805_vm2, %v3806_v19 }
0x1454   :  { %v3604_v3 = vpop.f32.mrb[34].mxu1 }
0x1455   :  { %v2896_v4 = vadd.f32 %v3604_v3, %v2800_v52  ;;  %v2890_v54 = vpop.f32.mrb[35].mxu1 }
0x1456   :  { %v2891_v55 = vadd.f32 %v2890_v54, %v2795_v53 }
0x1457   :  { %v2910_v56 = vmax.f32 %v2896_v4, 0.0 }
0x1458   :  { %v2909_v58 = vmax.f32 %v2891_v55, 0.0  ;;  %v3607_v59 = vpop.f32.mrb[36].mxu1 }
0x1459   :  { %v2906_v63 = vadd.f32 %v3607_v59, %v2810_v57  ;;  %v2900_v0 = vpop.f32.mrb[37].mxu1 }
0x145a   :  { %v3776_v1 = vpack.c.bf16 %v2910_v56, %v2909_v58  ;;  %v2901_v43 = vadd.f32 %v2900_v0, %v2805_v60 }
0x145b   :  { %v2912_v44 = vmax.f32 %v2906_v63, 0.0 }
0x145c   :  { %v2911_v2 = vmax.f32 %v2901_v43, 0.0  ;;  %3777 = vmatpush3.bf16.msra.mxu1 %v3776_v1 }
0x145d   :  { %3778 = vmatprep.subr.bf16.mxu1 %v3804_v18  ;;  %v2534_v18 = vld [vmem:[%s4575_s1 + $0x2c8] sm:$0xff] }
0x145e   :  { %v3779_v7 = vpack.c.bf16 %v2912_v44, %v2911_v2 }
0x1460   :  { %3780 = vmatpush3.bf16.msra.mxu1 %v3779_v7 }
0x1463   :  { %3617 = vmatmul.mubr.msk.f32.vlgmr.msra.gmra.mrb[38].mxu1 %vm190_vm1, %v2532_v8 }
0x1464   :  { %3619 = vmatprep.mubr.msk.f32.mxu1 %vm3805_vm2, %v3806_v19 }
0x1467   :  { %3620 = vmatmul.mubr.msk.f32.gmra.mrb[40].mxu1 %vm190_vm1, %v2533_v9 }
0x1468   :  { %3622 = vmatprep.mubr.msk.f32.mxu1 %vm3805_vm2, %v3806_v19 }
0x146b   :  { %3623 = vmatmul.mubr.msk.f32.gmra.mrb[4].mxu1 %vm190_vm1, %v2534_v18 }
0x1536   :  { %v3003_v16 = vpop.f32.mrb[38].mxu1 }
0x1537   :  { %v3004_v20 = vadd.f32 %v3003_v16, %v2916_v14  ;;  %v3618_v21 = vpop.f32.mrb[39].mxu1 }
0x1539   :  { %v3017_v19 = vadd.f32 %v3004_v20, %v4487_v61 }
0x153a   :  { %v3008_v24 = vpop.f32.mrb[40].mxu1 }
0x153b   :  { %3020 = vst [vmem:[%s4576_s3] sm:$0xff] %v3017_v19  ;;  %v3009_v28 = vadd.f32 %v3008_v24, %v2921_v23  ;;  %v3621_v29 = vpop.f32.mrb[41].mxu1 }
0x153d   :  { %v3018_v6 = vadd.f32 %v3009_v28, %v4490_v62 }
0x153e   :  { %v3013_v30 = vpop.f32.mrb[4].mxu1 }
0x153f   :  { %3021 = vst [vmem:[%s4576_s3 + $0x8] sm:$0xff] %v3018_v6  ;;  %v3786_v31 = vadd.f32 %v3785_v5, %v3013_v30  ;;  %v3624_v32 = vpop.f32.mrb[5].mxu1 }
0x1541   :  { %3022 = vst [vmem:[%s4577_s4] sm:$0xff] %v3786_v31 }

</bundles_post_ra>
